<compile_context>
chip_gen: v7x
topology: tpu7x:2x2x1
jax: 0.10.0
libtpu: 0.0.40
codegen_flags: <defaults>
</compile_context>

<pallas_src>
import math

import jax
import jax.numpy as jnp
from jax.experimental import pallas as pl
from jax.experimental.pallas import tpu as pltpu

N_HIDDEN = 6
IN_FEATURES = 16 * 40          # 640 (already a multiple of 128)
HIDDEN = 500                   # logical hidden width
HIDDEN_PAD = 512               # padded to 4 x 128 lanes
EPS = 1e-5


# ----------------------------------------------------------------------------
# Kernel: grid step i == hidden layer i; h persists in VMEM scratch
# ----------------------------------------------------------------------------
def _netc_kernel(x_ref, w0_ref, wh_ref, gamma_ref, beta_ref, wout_ref,
                 bout_ref, o_ref, h_ref):
    i = pl.program_id(0)
    gamma = gamma_ref[0]                       # (1, 512) f32
    beta = beta_ref[0]                         # (1, 512) f32

    def bn_relu(y):
        # Training-mode BatchNorm1d (biased, centered variance) fused with
        # ReLU; result cast to bf16 to feed the next layer's MXU directly.
        mean = jnp.mean(y, axis=0, keepdims=True)
        c = y - mean
        var = jnp.mean(c * c, axis=0, keepdims=True)
        scale = gamma * jax.lax.rsqrt(var + EPS)        # EUP rsqrt
        return jnp.maximum(c * scale + beta, 0.0).astype(h_ref.dtype)

    @pl.when(i == 0)
    def _():
        # Layer 0: (B, 640) @ (640, 512).  Hidden bias omitted (cancels in BN).
        y = jnp.dot(x_ref[...], w0_ref[...],
                    preferred_element_type=jnp.float32)
        h_ref[...] = bn_relu(y)

    @pl.when(i > 0)
    def _():
        # Layers 1..5: (B, 512) @ (512, 512); weights streamed per grid step.
        y = jnp.dot(h_ref[...], wh_ref[0],
                    preferred_element_type=jnp.float32)
        h_ref[...] = bn_relu(y)

    @pl.when(i == pl.num_programs(0) - 1)
    def _():
        # Final Linear(512 -> nclass) with bias after the last hidden layer.
        logits = jnp.dot(h_ref[...], wout_ref[...],
                         preferred_element_type=jnp.float32) + bout_ref[...]
        o_ref[...] = logits.astype(o_ref.dtype)


def _vmem_limit_bytes(batch, nclass):
    bf, f32 = 2, 4
    resident = (
        batch * IN_FEATURES * bf                     # x
        + IN_FEATURES * HIDDEN_PAD * bf              # W0
        + 2 * HIDDEN_PAD * HIDDEN_PAD * bf           # hidden W (double buffer)
        + 2 * 2 * HIDDEN_PAD * f32                   # gamma/beta buffers
        + HIDDEN_PAD * nclass * bf + nclass * f32    # final linear
        + batch * HIDDEN_PAD * bf                    # h scratch
        + batch * nclass * f32                       # output
        + 4 * batch * HIDDEN_PAD * f32)              # f32 temporaries headroom
    # 2x headroom, floor 16 MiB, cap 48 MiB (fits v7x's 64 MiB physical VMEM).
    return int(min(max(2 * resident, 16 << 20), 48 << 20))


# ----------------------------------------------------------------------------
# Forward pass (single pallas_call under one jit)
# ----------------------------------------------------------------------------
@jax.jit
def netC_forward(params, x):
    """x: (B, 16, 40) or (B, 640) -> (B, nclass), squeezed like torch."""
    x = x.reshape(x.shape[0], -1).astype(jnp.bfloat16)     # input.view(B, -1)
    batch = x.shape[0]
    nclass = params["w_out"].shape[1]

    grid_spec = pltpu.PrefetchScalarGridSpec(
        num_scalar_prefetch=0,
        grid=(N_HIDDEN,),
        in_specs=[
            pl.BlockSpec((batch, IN_FEATURES), lambda i: (0, 0)),       # x
            pl.BlockSpec((IN_FEATURES, HIDDEN_PAD), lambda i: (0, 0)),  # W0
            # Step i (i>=1) uses stacked hidden weight [i-1]; step 0's fetch
            # of [0] doubles as the prefetch for step 1 (no refetch).
            pl.BlockSpec((1, HIDDEN_PAD, HIDDEN_PAD),
                         lambda i: (jnp.maximum(i - 1, 0), 0, 0)),
            pl.BlockSpec((1, 1, HIDDEN_PAD), lambda i: (i, 0, 0)),      # gamma
            pl.BlockSpec((1, 1, HIDDEN_PAD), lambda i: (i, 0, 0)),      # beta
            pl.BlockSpec((HIDDEN_PAD, nclass), lambda i: (0, 0)),       # W_out
            pl.BlockSpec((1, nclass), lambda i: (0, 0)),                # b_out
        ],
        out_specs=pl.BlockSpec((batch, nclass), lambda i: (0, 0)),
        scratch_shapes=[pltpu.VMEM((batch, HIDDEN_PAD), jnp.bfloat16)],
    )

    out = pl.pallas_call(
        _netc_kernel,
        out_shape=jax.ShapeDtypeStruct((batch, nclass), jnp.float32),
        grid_spec=grid_spec,
        compiler_params=pltpu.CompilerParams(
            dimension_semantics=("arbitrary",),        # layers are sequential
            vmem_limit_bytes=_vmem_limit_bytes(batch, nclass)),
    )(x, params["w0"], params["w_hid"], params["gamma"], params["beta"],
      params["w_out"], params["b_out"])
    return jnp.squeeze(out)                            # out.squeeze()


# ----------------------------------------------------------------------------
# Parameter construction (deterministic, PyTorch-like init, padded + bf16)
# ----------------------------------------------------------------------------
def init_netC_params(key, nclass):
    """Linear: U(-1/sqrt(fan_in), 1/sqrt(fan_in)); BatchNorm1d: gamma=1, beta=0.

    Hidden width is stored padded 500 -> 512.  Padded W columns / rows and
    padded gamma/beta entries are zero, so padded channels stay exactly 0
    through BN + ReLU.  Hidden-layer Linear biases are not materialized (they
    cancel exactly under training-mode BatchNorm).  Weights in bf16."""
    keys = jax.random.split(key, N_HIDDEN + 2)
    pad = HIDDEN_PAD - HIDDEN

    b0 = 1.0 / math.sqrt(IN_FEATURES)
    w0 = jax.random.uniform(keys[0], (IN_FEATURES, HIDDEN), jnp.float32,
                            -b0, b0)
    w0 = jnp.pad(w0, ((0, 0), (0, pad))).astype(jnp.bfloat16)

    bh = 1.0 / math.sqrt(HIDDEN)
    w_hid = []
    for l in range(1, N_HIDDEN):
        w = jax.random.uniform(keys[l], (HIDDEN, HIDDEN), jnp.float32,
                               -bh, bh)
        w_hid.append(jnp.pad(w, ((0, pad), (0, pad))))
    w_hid = jnp.stack(w_hid).astype(jnp.bfloat16)        # (5, 512, 512)

    gamma = jnp.concatenate(
        [jnp.ones((N_HIDDEN, 1, HIDDEN), jnp.float32),
         jnp.zeros((N_HIDDEN, 1, pad), jnp.float32)], axis=-1)
    beta = jnp.zeros((N_HIDDEN, 1, HIDDEN_PAD), jnp.float32)

    w_out = jax.random.uniform(keys[N_HIDDEN], (HIDDEN, nclass), jnp.float32,
                               -bh, bh)
    w_out = jnp.pad(w_out, ((0, pad), (0, 0))).astype(jnp.bfloat16)
    b_out = jax.random.uniform(keys[N_HIDDEN + 1], (1, nclass), jnp.float32,
                               -bh, bh)
    return dict(w0=w0, w_hid=w_hid, gamma=gamma, beta=beta,
                w_out=w_out, b_out=b_out)


# ----------------------------------------------------------------------------
if __name__ == "__main__":
    key = jax.random.PRNGKey(0)
    k_in, k_par = jax.random.split(key)

    nclass = 10
    batch = 8       # small demo batch; the kernel supports (and is far more
                    # efficient at) much larger B -- raise it in the GAN loop.
    x = jax.random.normal(k_in, (batch, 16, 40), jnp.float32)
    params = init_netC_params(k_par, nclass)

    out = jax.block_until_ready(netC_forward(params, x))

    assert out.shape == (batch, nclass), out.shape
    assert bool(jnp.all(jnp.isfinite(out)))
    print("KERNEL_OK")
</pallas_src>

<mosaic_0001>
module attributes {stable_mosaic.version = 11 : i64} {
  func.func @_netc_kernel(%arg0: i32, %arg1: memref<8x640xbf16, #tpu.memory_space<vmem>>, %arg2: memref<640x512xbf16, #tpu.memory_space<vmem>>, %arg3: memref<1x512x512xbf16, #tpu.memory_space<vmem>>, %arg4: memref<1x1x512xf32, #tpu.memory_space<vmem>>, %arg5: memref<1x1x512xf32, #tpu.memory_space<vmem>>, %arg6: memref<512x10xbf16, #tpu.memory_space<vmem>>, %arg7: memref<1x10xf32, #tpu.memory_space<vmem>>, %arg8: memref<8x10xf32, #tpu.memory_space<vmem>>, %arg9: memref<8x512xbf16, #tpu.memory_space<vmem>>) attributes {dimension_semantics = [#tpu.dimension_semantics<arbitrary>], iteration_bounds = array<i64: 6>, scalar_prefetch = 0 : i64, scratch_operands = 1 : i64, tpu.core_type = #tpu.core_type<tc>, window_params = [{pipeline_mode = #tpu.pipeline_mode<synchronous>, transform_indices = @transform_0, window_bounds = array<i64: 8, 640>}, {pipeline_mode = #tpu.pipeline_mode<synchronous>, transform_indices = @transform_1, window_bounds = array<i64: 640, 512>}, {transform_indices = @transform_2, window_bounds = array<i64: 1, 512, 512>}, {transform_indices = @transform_3, window_bounds = array<i64: 1, 1, 512>}, {transform_indices = @transform_4, window_bounds = array<i64: 1, 1, 512>}, {pipeline_mode = #tpu.pipeline_mode<synchronous>, transform_indices = @transform_5, window_bounds = array<i64: 512, 10>}, {pipeline_mode = #tpu.pipeline_mode<synchronous>, transform_indices = @transform_6, window_bounds = array<i64: 1, 10>}, {pipeline_mode = #tpu.pipeline_mode<synchronous>, transform_indices = @transform_7, window_bounds = array<i64: 8, 10>}]} {
    %c0 = arith.constant 0 : index
    %c0_0 = arith.constant 0 : index
    %c0_1 = arith.constant 0 : index
    %0 = vector.load %arg4[%c0, %c0_0, %c0_1] : memref<1x1x512xf32, #tpu.memory_space<vmem>>, vector<1x1x512xf32>
    %1 = vector.shape_cast %0 : vector<1x1x512xf32> to vector<1x512xf32>
    %c0_2 = arith.constant 0 : index
    %c0_3 = arith.constant 0 : index
    %c0_4 = arith.constant 0 : index
    %2 = vector.load %arg5[%c0_2, %c0_3, %c0_4] : memref<1x1x512xf32, #tpu.memory_space<vmem>>, vector<1x1x512xf32>
    %3 = vector.shape_cast %2 : vector<1x1x512xf32> to vector<1x512xf32>
    %c0_i32 = arith.constant 0 : i32
    %4 = arith.cmpi eq, %arg0, %c0_i32 : i32
    %5 = arith.extui %4 : i1 to i32
    %c0_i32_5 = arith.constant 0 : i32
    %6 = arith.cmpi ne, %5, %c0_i32_5 : i32
    scf.if %6 {
      %c0_9 = arith.constant 0 : index
      %c0_10 = arith.constant 0 : index
      %13 = vector.load %arg1[%c0_9, %c0_10] : memref<8x640xbf16, #tpu.memory_space<vmem>>, vector<8x640xbf16>
      %c0_11 = arith.constant 0 : index
      %c0_12 = arith.constant 0 : index
      %14 = vector.load %arg2[%c0_11, %c0_12] : memref<640x512xbf16, #tpu.memory_space<vmem>>, vector<640x512xbf16>
      %cst = arith.constant dense<0.000000e+00> : vector<8x512xf32>
      %15 = tpu.matmul %13, %14, %cst {dimension_numbers = #tpu.dot_dimension_numbers<[1], [0], [0], [1], [0, 0, 1, 1], [], []>} : vector<8x640xbf16>, vector<640x512xbf16>, vector<8x512xf32> -> vector<8x512xf32>
      %cst_13 = arith.constant dense<0.000000e+00> : vector<512xf32>
      %16 = vector.multi_reduction <add>, %15, %cst_13 [0] : vector<8x512xf32> to vector<512xf32>
      %17 = vector.shape_cast %16 : vector<512xf32> to vector<1x512xf32>
      %cst_14 = arith.constant 8.000000e+00 : f32
      %18 = vector.broadcast %cst_14 : f32 to vector<1x512xf32>
      %19 = arith.divf %17, %18 : vector<1x512xf32>
      %20 = vector.broadcast %19 : vector<1x512xf32> to vector<8x512xf32>
      %21 = arith.subf %15, %20 : vector<8x512xf32>
      %22 = arith.mulf %21, %21 : vector<8x512xf32>
      %cst_15 = arith.constant dense<0.000000e+00> : vector<512xf32>
      %23 = vector.multi_reduction <add>, %22, %cst_15 [0] : vector<8x512xf32> to vector<512xf32>
      %24 = vector.shape_cast %23 : vector<512xf32> to vector<1x512xf32>
      %cst_16 = arith.constant 8.000000e+00 : f32
      %25 = vector.broadcast %cst_16 : f32 to vector<1x512xf32>
      %26 = arith.divf %24, %25 : vector<1x512xf32>
      %cst_17 = arith.constant 9.99999974E-6 : f32
      %27 = vector.broadcast %cst_17 : f32 to vector<1x512xf32>
      %28 = arith.addf %26, %27 : vector<1x512xf32>
      %29 = math.rsqrt %28 : vector<1x512xf32>
      %30 = arith.mulf %1, %29 : vector<1x512xf32>
      %31 = vector.broadcast %30 : vector<1x512xf32> to vector<8x512xf32>
      %32 = arith.mulf %21, %31 : vector<8x512xf32>
      %33 = vector.broadcast %3 : vector<1x512xf32> to vector<8x512xf32>
      %34 = arith.addf %32, %33 : vector<8x512xf32>
      %cst_18 = arith.constant 0.000000e+00 : f32
      %35 = vector.broadcast %cst_18 : f32 to vector<8x512xf32>
      %36 = arith.maximumf %34, %35 : vector<8x512xf32>
      %37 = arith.truncf %36 : vector<8x512xf32> to vector<8x512xbf16>
      %c0_19 = arith.constant 0 : index
      %c0_20 = arith.constant 0 : index
      %38 = vector.load %arg9[%c0_19, %c0_20] : memref<8x512xbf16, #tpu.memory_space<vmem>>, vector<8x512xbf16>
      tpu.vector_store %arg9[%c0_19, %c0_20], %37 {strides = array<i32>} : memref<8x512xbf16, #tpu.memory_space<vmem>>, vector<8x512xbf16>,
    } else {
    }
    %c0_i32_6 = arith.constant 0 : i32
    %7 = arith.cmpi sgt, %arg0, %c0_i32_6 : i32
    %8 = arith.extui %7 : i1 to i32
    %c0_i32_7 = arith.constant 0 : i32
    %9 = arith.cmpi ne, %8, %c0_i32_7 : i32
    scf.if %9 {
      %c0_9 = arith.constant 0 : index
      %c0_10 = arith.constant 0 : index
      %13 = vector.load %arg9[%c0_9, %c0_10] : memref<8x512xbf16, #tpu.memory_space<vmem>>, vector<8x512xbf16>
      %c0_11 = arith.constant 0 : index
      %c0_12 = arith.constant 0 : index
      %c0_13 = arith.constant 0 : index
      %14 = vector.load %arg3[%c0_11, %c0_12, %c0_13] : memref<1x512x512xbf16, #tpu.memory_space<vmem>>, vector<1x512x512xbf16>
      %15 = vector.shape_cast %14 : vector<1x512x512xbf16> to vector<512x512xbf16>
      %cst = arith.constant dense<0.000000e+00> : vector<8x512xf32>
      %16 = tpu.matmul %13, %15, %cst {dimension_numbers = #tpu.dot_dimension_numbers<[1], [0], [0], [1], [0, 0, 1, 1], [], []>} : vector<8x512xbf16>, vector<512x512xbf16>, vector<8x512xf32> -> vector<8x512xf32>
      %cst_14 = arith.constant dense<0.000000e+00> : vector<512xf32>
      %17 = vector.multi_reduction <add>, %16, %cst_14 [0] : vector<8x512xf32> to vector<512xf32>
      %18 = vector.shape_cast %17 : vector<512xf32> to vector<1x512xf32>
      %cst_15 = arith.constant 8.000000e+00 : f32
      %19 = vector.broadcast %cst_15 : f32 to vector<1x512xf32>
      %20 = arith.divf %18, %19 : vector<1x512xf32>
      %21 = vector.broadcast %20 : vector<1x512xf32> to vector<8x512xf32>
      %22 = arith.subf %16, %21 : vector<8x512xf32>
      %23 = arith.mulf %22, %22 : vector<8x512xf32>
      %cst_16 = arith.constant dense<0.000000e+00> : vector<512xf32>
      %24 = vector.multi_reduction <add>, %23, %cst_16 [0] : vector<8x512xf32> to vector<512xf32>
      %25 = vector.shape_cast %24 : vector<512xf32> to vector<1x512xf32>
      %cst_17 = arith.constant 8.000000e+00 : f32
      %26 = vector.broadcast %cst_17 : f32 to vector<1x512xf32>
      %27 = arith.divf %25, %26 : vector<1x512xf32>
      %cst_18 = arith.constant 9.99999974E-6 : f32
      %28 = vector.broadcast %cst_18 : f32 to vector<1x512xf32>
      %29 = arith.addf %27, %28 : vector<1x512xf32>
      %30 = math.rsqrt %29 : vector<1x512xf32>
      %31 = arith.mulf %1, %30 : vector<1x512xf32>
      %32 = vector.broadcast %31 : vector<1x512xf32> to vector<8x512xf32>
      %33 = arith.mulf %22, %32 : vector<8x512xf32>
      %34 = vector.broadcast %3 : vector<1x512xf32> to vector<8x512xf32>
      %35 = arith.addf %33, %34 : vector<8x512xf32>
      %cst_19 = arith.constant 0.000000e+00 : f32
      %36 = vector.broadcast %cst_19 : f32 to vector<8x512xf32>
      %37 = arith.maximumf %35, %36 : vector<8x512xf32>
      %38 = arith.truncf %37 : vector<8x512xf32> to vector<8x512xbf16>
      %c0_20 = arith.constant 0 : index
      %c0_21 = arith.constant 0 : index
      %39 = vector.load %arg9[%c0_20, %c0_21] : memref<8x512xbf16, #tpu.memory_space<vmem>>, vector<8x512xbf16>
      tpu.vector_store %arg9[%c0_20, %c0_21], %38 {strides = array<i32>} : memref<8x512xbf16, #tpu.memory_space<vmem>>, vector<8x512xbf16>,
    } else {
    }
    %c5_i32 = arith.constant 5 : i32
    %10 = arith.cmpi eq, %arg0, %c5_i32 : i32
    %11 = arith.extui %10 : i1 to i32
    %c0_i32_8 = arith.constant 0 : i32
    %12 = arith.cmpi ne, %11, %c0_i32_8 : i32
    scf.if %12 {
      %c0_9 = arith.constant 0 : index
      %c0_10 = arith.constant 0 : index
      %13 = vector.load %arg9[%c0_9, %c0_10] : memref<8x512xbf16, #tpu.memory_space<vmem>>, vector<8x512xbf16>
      %c0_11 = arith.constant 0 : index
      %c0_12 = arith.constant 0 : index
      %14 = vector.load %arg6[%c0_11, %c0_12] : memref<512x10xbf16, #tpu.memory_space<vmem>>, vector<512x10xbf16>
      %cst = arith.constant dense<0.000000e+00> : vector<8x10xf32>
      %15 = tpu.matmul %13, %14, %cst {dimension_numbers = #tpu.dot_dimension_numbers<[1], [0], [0], [1], [0, 0, 1, 1], [], []>} : vector<8x512xbf16>, vector<512x10xbf16>, vector<8x10xf32> -> vector<8x10xf32>
      %c0_13 = arith.constant 0 : index
      %c0_14 = arith.constant 0 : index
      %16 = vector.load %arg7[%c0_13, %c0_14] : memref<1x10xf32, #tpu.memory_space<vmem>>, vector<1x10xf32>
      %17 = vector.broadcast %16 : vector<1x10xf32> to vector<8x10xf32>
      %18 = arith.addf %15, %17 : vector<8x10xf32>
      %c0_15 = arith.constant 0 : index
      %c0_16 = arith.constant 0 : index
      %19 = vector.load %arg8[%c0_15, %c0_16] : memref<8x10xf32, #tpu.memory_space<vmem>>, vector<8x10xf32>
      tpu.vector_store %arg8[%c0_15, %c0_16], %18 {strides = array<i32>} : memref<8x10xf32, #tpu.memory_space<vmem>>, vector<8x10xf32>,
    } else {
    }
    return
  }
  func.func @transform_0(%arg0: i32) -> (i32, i32) {
    %c0_i32 = arith.constant 0 : i32
    %c0_i32_0 = arith.constant 0 : i32
    %c0_i32_1 = arith.constant 0 : i32
    return %c0_i32, %c0_i32_0 : i32, i32
  }
  func.func @transform_1(%arg0: i32) -> (i32, i32) {
    %c0_i32 = arith.constant 0 : i32
    %c0_i32_0 = arith.constant 0 : i32
    %c0_i32_1 = arith.constant 0 : i32
    return %c0_i32, %c0_i32_0 : i32, i32
  }
  func.func @transform_2(%arg0: i32) -> (i32, i32, i32) {
    %c1_i32 = arith.constant 1 : i32
    %0 = arith.subi %arg0, %c1_i32 : i32
    %c0_i32 = arith.constant 0 : i32
    %1 = arith.maxsi %0, %c0_i32 : i32
    %c0_i32_0 = arith.constant 0 : i32
    %c0_i32_1 = arith.constant 0 : i32
    %c0_i32_2 = arith.constant 0 : i32
    return %1, %c0_i32_0, %c0_i32_1 : i32, i32, i32
  }
  func.func @transform_3(%arg0: i32) -> (i32, i32, i32) {
    %c0_i32 = arith.constant 0 : i32
    %c0_i32_0 = arith.constant 0 : i32
    %c0_i32_1 = arith.constant 0 : i32
    return %arg0, %c0_i32, %c0_i32_0 : i32, i32, i32
  }
  func.func @transform_4(%arg0: i32) -> (i32, i32, i32) {
    %c0_i32 = arith.constant 0 : i32
    %c0_i32_0 = arith.constant 0 : i32
    %c0_i32_1 = arith.constant 0 : i32
    return %arg0, %c0_i32, %c0_i32_0 : i32, i32, i32
  }
  func.func @transform_5(%arg0: i32) -> (i32, i32) {
    %c0_i32 = arith.constant 0 : i32
    %c0_i32_0 = arith.constant 0 : i32
    %c0_i32_1 = arith.constant 0 : i32
    return %c0_i32, %c0_i32_0 : i32, i32
  }
  func.func @transform_6(%arg0: i32) -> (i32, i32) {
    %c0_i32 = arith.constant 0 : i32
    %c0_i32_0 = arith.constant 0 : i32
    %c0_i32_1 = arith.constant 0 : i32
    return %c0_i32, %c0_i32_0 : i32, i32
  }
  func.func @transform_7(%arg0: i32) -> (i32, i32) {
    %c0_i32 = arith.constant 0 : i32
    %c0_i32_0 = arith.constant 0 : i32
    %c0_i32_1 = arith.constant 0 : i32
    return %c0_i32, %c0_i32_0 : i32, i32
  }
}

</mosaic_0001>

<bundles_post_ra>
// kernel: netC_forward.1
= control target key start
LH: loop header
LB: loop body
LE: loop exit
PB: predicated region body
PF: predicated region fallthrough
CT: control target
= control target key end

     0   :  { %s5402_s0 = inlined_call_operand.vmem [shape: bf16[8,640], index: 0, kind: input, shape index: {}]   ;;  %s5403_s1 = inlined_call_operand.hbm [shape: bf16[640,512], index: 1, kind: input, shape index: {}]   ;;  %s5404_s2 = inlined_call_operand.hbm [shape: bf16[5,512,512], index: 2, kind: input, shape index: {}]   ;;  %s5405_s3 = inlined_call_operand.hbm [shape: f32[6,1,512], index: 3, kind: input, shape index: {}]   ;;  %s5406_s4 = inlined_call_operand.hbm [shape: f32[6,1,512], index: 4, kind: input, shape index: {}]   ;;  %s5407_s5 = inlined_call_operand.vmem [shape: bf16[512,10], index: 5, kind: input, shape index: {}]   ;;  %s5408_s6 = inlined_call_operand.hbm [shape: f32[1,10], index: 6, kind: input, shape index: {}]   ;;  %s5409_s7 = inlined_call_operand.hbm [shape: f32[8,10], index: 7, kind: output, shape index: {}]  }
   0x1   :  { %5420 = sst [smem:[#allocation19_spill]] %s5404_s2 }
   0x2   :  { %5421 = sst [smem:[#allocation20_spill]] %s5407_s5 }
   0x3   :  { %5422 = sst [smem:[#allocation21_spill]] %s5408_s6 }
   0x4   :  { %5423 = sst [smem:[#allocation22_spill]] %s5409_s7 }
   0x5   :  { %12 = vsyncpa [#allocation4], 0 }
   0x6   :  { %13 = vsyncpa [#allocation7], 0 }
   0x7   :  { %15 = vsyncpa [#allocation7 + $0x1], 0 }
   0x8   :  { %16 = vsyncpa [#allocation10], 0 }
   0x9   :  { %18 = vsyncpa [#allocation10 + $0x1], 0 }
   0xa   :  { %19 = vsyncpa [#allocation5], 0  ;;  %s4764_s24 = smov 0   ;;  %s4766_s25 = smov 0  }
   0xb   :  { %s4768_s26 = smov 0   ;;  %s4770_s27 = smov 0  }
   0xc   :  { %s4772_s28 = smov 0   ;;  %s4774_s29 = smov 0  }
   0xd   :  { %s4776_s30 = smov 0  }
   0xe LB: > { %s4796_s8 = sadd.s32 4294967295, %s4711_s30   ;;  %p93_p0 = scmp.ne.s32.totalorder %s4703_s28, %s4699_s27  ;;  %s4711_s30 = sphi %s4776_s30, %s5458_s30   ;;  %s4707_s29 = sphi %s4774_s29, %s5457_s29   ;;  %s4703_s28 = sphi %s4772_s28, %s5456_s28   ;;  %s4699_s27 = sphi %s4770_s27, %s5455_s27   ;;  %s4695_s26 = sphi %s4768_s26, %s5454_s26   ;;  %s4691_s25 = sphi %s4766_s25, %s5453_s25   ;;  %s4687_s24 = sphi %s4764_s24, %s5452_s24  }
   0xf   : > { %p5410_p1 = scmp.eq.s32.totalorder %s4796_s8, 0  ;;  %p119_p2 = scmp.ne.s32.totalorder %s4691_s25, %s4687_s24 }
  0x10   : > { %p3422_p3 = scmp.ge.s32.totalorder %s4711_s30, 1  ;;  %p219_p4 = scmp.lt.s32.totalorder %s4711_s30, 7 }
  0x11   : > { %p4805_p5 = por %p5410_p1, %p93_p0  ;;  %p4811_p6 = por %p119_p2, %p5410_p1 }
  0x12   : > { %p4815_p7 = pnand %p3422_p3, %p219_p4  ;;  %s4713_s12 = smov [#allocation11]  }
  0x13   : > { %s5424_s9 = scalar_select %p4805_p5, 1, 0 }
  0x14   : > { %s5425_s10 = scalar_select %p4811_p6, 1, 0 }
  0x15   : > { %s5426_s11 = scalar_select %p4815_p7, 1, 0 }
  0x16   : > { %p3880_p9 = pneg %p4815_p7  ;;  %s251_s13 = sshll.u32 %s4713_s12, 4  ;;  %s252_s13 = int_to_ptr.vmem [resolvable:$true] %s251_s13 }
  0x17   : > { %s4829_s15 = sadd.s32 1, %s4711_s30   ;;  %s5428_s6 = sld [smem:[#allocation21_spill]] }
  0x18   : > { %p4824_p10 = pnand %p3880_p9, %p5410_p1  ;;  %s3421_s16 = sadd.s32 4294967295, %s4829_s15 }
  0x1a   : > { %p5418_p13 = pneg %p4824_p10 }
  0x1d   : > { %s4461_s19 = scalar_lea.hbm %s5428_s6, 16 }
  0x1e   : > { %p4462_p12 = scmp.ne.s32.totalorder %s5428_s6, %s4461_s19  ;;  %p4468_p3 = scmp.lt.u32.totalorder %s4461_s19, %s5428_s6 }
  0x20   : > { %p4464_p0 = pnand %p5418_p13, %p4462_p12 }
  0x22   : > { %p4465_p2 = pneg %p4464_p0 }
  0x24   : > { %p4470_p4 = pnand %p4468_p3, %p4465_p2 }
  0x26   : > { %4473 = shalt.err (!%p4470_p4)
}
  0x27   : > { %s4474_s24 = scalar_lea.vmem %s252_s13, 16  ;;  %s4481_s27 = scalar_lea.vmem %s252_s13, 32 }
  0x28   : > { %p4475_p9 = scmp.ne.s32.totalorder %s252_s13, %s4474_s24  ;;  %p4482_p11 = scmp.lt.s32.totalorder %s252_s13, %s252_s13 }
  0x29   : > { %p4483_p6 = scmp.lt.s32.totalorder %s4481_s27, %s4474_s24 }
  0x2a   : > { %p4477_p8 = pnand %p4475_p9, %p5418_p13 }
  0x2b   : > { %p4484_p5 = por %p4483_p6, %p4482_p11 }
  0x2c   : > { %p4478_p1 = pneg %p4477_p8 }
  0x2e   : > { %p4485_p7 = pnand %p4484_p5, %p4478_p1 }
  0x30   : > { %4488 = shalt.err (!%p4485_p7)
}
  0x31   : > { %3886 = dma.hbm_to_vmem [thread:$0]  (!%p4824_p10), %s5428_s6, 16, %s252_s13, [#allocation10]  }
  0x32   : > { %p5429_p1 = scmp.gt.s32.totalorder %s4796_s8, 0  ;;  %p75_p5 = scmp.gt.s32.totalorder %s3421_s16, 0 }
  0x33   : > { %s80_s19 = sadd.s32 1, %s4707_s29  ;;  %p87_p6 = scmp.ne.s32.totalorder %s4707_s29, %s4703_s28 }
  0x34   : > { %s73_s18 = scalar_select %p5429_p1, %s4796_s8, 0 }
  0x35   : > { %p5417_p7 = scmp.eq.s32.totalorder %s4711_s30, 0  ;;  %s5460_s16 = smov (!%p75_p5, %s3421_s16), 0 }
  0x36   : > { %s103_s21 = ssub.s32 %s4711_s30, %s4829_s15  ;;  %s77_s22 = ssub.s32 %s73_s18, %s5460_s16 }
  0x37   : > { %p4864_p8 = por %p5417_p7, %p87_p6  ;;  %p4870_p11 = scmp.eq.s32.totalorder %s103_s21, 0 }
  0x38   : > { %p78_p12 = scmp.eq.s32.totalorder %s77_s22, 0  ;;  %p5416_p0 = scmp.lt.s32.totalorder %s4711_s30, 6 }
  0x39   : > { %s5431_s23 = scalar_select %p4870_p11, 1, 0 }
  0x3a   : > { %s4876_s13 = scalar_select %p78_p12, %s4707_s29, %s80_s19  }
  0x3b   : > { %s5419_s24 = sand.u32 1, %s4711_s30   ;;  %s264_s27 = sand.u32 1, %s4707_s29  }
  0x3c   : > { %s3426_s12 = sshll.u32 %s264_s27, 10  ;;  %s3787_s17 = sshll.u32 %s73_s18, 14 }
  0x3d   : > { %s5432_s2 = sld [smem:[#allocation19_spill]]  ;;  %s266_s16 = scalar_lea.vmem [#allocation6], %s3426_s12 }
  0x3e   : > { %s276_s21 = sshll.u32 %s266_s16, 4  ;;  %p4891_p2 = pnand %p5416_p0, %p4864_p8  ;;  %s4885_s21 = int_to_ptr.vmem [resolvable:$true] %s276_s21 }
  0x3f   : > { %s4714_s18 = smov [#allocation3]   ;;  %s4899_s7 = scalar_lea.sflag [#allocation7], %s5419_s24 }
  0x40   : > { %s4895_s6 = sshll.u32 %s4714_s18, 4  ;;  %p4491_p4 = pneg %p4891_p2  ;;  %s235_s6 = int_to_ptr.vmem [resolvable:$true] %s4895_s6 }
  0x43   : > { %s4883_s5 = scalar_lea.hbm %s5432_s2, %s3787_s17  ;;  %s4494_s12 = scalar_lea.hbm %s5432_s2, 81920 }
  0x44   : > { %s4489_s22 = scalar_lea.hbm %s4883_s5, 16384  ;;  %p4495_p5 = scmp.lt.u32.totalorder %s4883_s5, %s5432_s2 }
  0x45   : > { %p4490_p3 = scmp.ne.s32.totalorder %s4883_s5, %s4489_s22  ;;  %p4496_p6 = scmp.lt.u32.totalorder %s4494_s12, %s4489_s22 }
  0x46   : > { %p4498_p12 = scmp.lt.u32.totalorder %s4489_s22, %s4883_s5 }
  0x47   : > { %p4492_p9 = pnand %p4491_p4, %p4490_p3  ;;  %p4497_p8 = por %p4496_p6, %p4495_p5 }
  0x49   : > { %p4493_p1 = pneg %p4492_p9  ;;  %p4499_p0 = por %p4498_p12, %p4497_p8 }
  0x4b   : > { %p4500_p7 = pnand %p4499_p0, %p4493_p1 }
  0x4d   : > { %4503 = shalt.err (!%p4500_p7)
}
  0x4e   : > { %s4504_s18 = scalar_lea.vmem %s4885_s21, 16384  ;;  %s4715_s20 = smov [#allocation6]  }
  0x4f   : > { %p4505_p3 = scmp.ne.s32.totalorder %s4885_s21, %s4504_s18  ;;  %s4509_s27 = sshll.u32 %s4715_s20, 4  ;;  %s4510_s27 = int_to_ptr.vmem [resolvable:$false] %s4509_s27 }
  0x50   : > { %s4511_s17 = scalar_lea.vmem %s4510_s27, 32768  ;;  %p4512_p11 = scmp.lt.s32.totalorder %s4885_s21, %s4510_s27 }
  0x51   : > { %p4507_p9 = pnand %p4505_p3, %p4491_p4  ;;  %p4513_p5 = scmp.lt.s32.totalorder %s4511_s17, %s4504_s18 }
  0x53   : > { %p4508_p13 = pneg %p4507_p9  ;;  %p4514_p6 = por %p4513_p5, %p4512_p11 }
  0x55   : > { %p4515_p8 = pnand %p4514_p6, %p4508_p13 }
  0x57   : > { %4518 = shalt.err (!%p4515_p8)
}
  0x58   : > { %s4716_s22 = smov 256   ;;  %s4717_s12 = smov 16  }
  0x59   : > { %3890 = dma.hbm_to_vmem [thread:$0]  (!%p4891_p2), %s4883_s5, 16384, %s4885_s21, %s4899_s7, %s4716_s22, %s4716_s22, %s4717_s12  }
  0x5a   : > { %s4519_s24 = scalar_lea.hbm %s5403_s1, 20480  ;;  %p5434_p7 = pneg %p4824_p10 }
  0x5b   : > { %p4520_p13 = scmp.ne.s32.totalorder %s5403_s1, %s4519_s24  ;;  %p4526_p4 = scmp.lt.u32.totalorder %s4519_s24, %s5403_s1 }
  0x5d   : > { %p4522_p11 = pnand %p4520_p13, %p5434_p7 }
  0x5f   : > { %p4523_p0 = pneg %p4522_p11 }
  0x61   : > { %p4528_p1 = pnand %p4526_p4, %p4523_p0 }
  0x63   : > { %4531 = shalt.err (!%p4528_p1)
}
  0x64   : > { %s4532_s5 = scalar_lea.vmem %s235_s6, 20480  ;;  %p5435_p12 = pmov %p5434_p7 }
  0x65   : > { %p4533_p2 = scmp.ne.s32.totalorder %s235_s6, %s4532_s5  ;;  %p4540_p5 = scmp.lt.s32.totalorder %s235_s6, %s235_s6 }
  0x66   : > { %p4541_p6 = scmp.lt.s32.totalorder %s4532_s5, %s4532_s5 }
  0x67   : > { %p4535_p3 = pnand %p4533_p2, %p5435_p12 }
  0x68   : > { %p4542_p8 = por %p4541_p6, %p4540_p5 }
  0x69   : > { %p4536_p9 = pneg %p4535_p3 }
  0x6b   : > { %p4543_p7 = pnand %p4542_p8, %p4536_p9 }
  0x6d   : > { %4546 = shalt.err (!%p4543_p7)
}
  0x6e   : > { %3883 = dma.hbm_to_vmem [thread:$0]  (!%p4824_p10), %s5403_s1, 20480, %s235_s6, [#allocation4], %s4716_s22, %s4716_s22, %s4717_s12  }
  0x6f   : > { %s106_s2 = sadd.s32 1, %s4695_s26  ;;  %p113_p13 = scmp.ne.s32.totalorder %s4695_s26, %s4691_s25 }
  0x70   : > { %p5436_p11 = scmp.ne.s32.totalorder %s5431_s23, 0  ;;  %p5437_p0 = scmp.eq.s32.totalorder %s4711_s30, 0 }
  0x71   : > { %s288_s14 = sand.u32 1, %s4695_s26   ;;  %s3788_s20 = sshll.u32 %s4711_s30, 6 }
  0x72   : > { %s4954_s24 = scalar_select %p5436_p11, %s4695_s26, %s106_s2  }
  0x73   : > { %p115_p4 = por %p113_p13, %p5437_p0  ;;  %s4959_s16 = sshll.u32 %s288_s14, 2 }
  0x74   : > { %s4967_s17 = scalar_lea.hbm %s5405_s3, %s3788_s20  ;;  %s290_s23 = scalar_lea.vmem [#allocation8], %s4959_s16 }
  0x75   : > { %s298_s6 = sshll.u32 %s290_s23, 4  ;;  %p5438_p10 = scmp.lt.s32.totalorder %s4711_s30, 6  ;;  %s299_s6 = int_to_ptr.vmem [resolvable:$true] %s298_s6 }
  0x76   : > { %s4547_s12 = scalar_lea.hbm %s4967_s17, 64  ;;  %s4552_s19 = scalar_lea.hbm %s5405_s3, 384 }
  0x77   : > { %p4972_p1 = pnand %p5438_p10, %p115_p4  ;;  %p4548_p2 = scmp.ne.s32.totalorder %s4967_s17, %s4547_s12 }
  0x78   : > { %p4553_p5 = scmp.lt.u32.totalorder %s4967_s17, %s5405_s3  ;;  %p4554_p6 = scmp.lt.u32.totalorder %s4552_s19, %s4547_s12 }
  0x79   : > { %p4549_p12 = pneg %p4972_p1  ;;  %p4556_p7 = scmp.lt.u32.totalorder %s4547_s12, %s4967_s17 }
  0x7a   : > { %p4555_p8 = por %p4554_p6, %p4553_p5 }
  0x7b   : > { %p4550_p3 = pnand %p4549_p12, %p4548_p2 }
  0x7c   : > { %p4557_p13 = por %p4556_p7, %p4555_p8 }
  0x7d   : > { %p4551_p9 = pneg %p4550_p3 }
  0x7f   : > { %p4558_p11 = pnand %p4557_p13, %p4551_p9 }
  0x81   : > { %4561 = shalt.err (!%p4558_p11)
}
  0x82   : > { %s4562_s27 = scalar_lea.vmem %s299_s6, 64  ;;  %s4718_s18 = smov [#allocation8]  }
  0x83   : > { %p4563_p0 = scmp.ne.s32.totalorder %s299_s6, %s4562_s27  ;;  %s4567_s23 = sshll.u32 %s4718_s18, 4  ;;  %s4568_s23 = int_to_ptr.vmem [resolvable:$false] %s4567_s23 }
  0x84   : > { %s4569_s5 = scalar_lea.vmem %s4568_s23, 128  ;;  %p4570_p2 = scmp.lt.s32.totalorder %s299_s6, %s4568_s23 }
  0x85   : > { %p4565_p4 = pnand %p4563_p0, %p4549_p12  ;;  %p4571_p3 = scmp.lt.s32.totalorder %s4569_s5, %s4562_s27 }
  0x87   : > { %p4566_p10 = pneg %p4565_p4  ;;  %p4572_p5 = por %p4571_p3, %p4570_p2 }
  0x89   : > { %p4573_p6 = pnand %p4572_p5, %p4566_p10 }
  0x8b   : > { %4576 = shalt.err (!%p4573_p6)
}
  0x8c   : > { %3893 = dma.hbm_to_vmem [thread:$0]  (!%p4972_p1), %s4967_s17, 64, %s299_s6, %s4899_s7  }
  0x8d   : > { %s5003_s19 = scalar_lea.hbm %s5406_s4, %s3788_s20  ;;  %s309_s2 = scalar_lea.vmem [#allocation9], %s4959_s16 }
  0x8e   : > { %s317_s14 = sshll.u32 %s309_s2, 4  ;;  %s5440_s27 = sand.u32 1, %s4711_s30   ;;  %s318_s14 = int_to_ptr.vmem [resolvable:$true] %s317_s14 }
  0x8f   : > { %s306_s18 = scalar_lea.sflag [#allocation10], %s5440_s27  ;;  %s4577_s23 = scalar_lea.hbm %s5003_s19, 64 }
  0x90   : > { %p4578_p9 = scmp.ne.s32.totalorder %s5003_s19, %s4577_s23  ;;  %s4582_s20 = scalar_lea.hbm %s5406_s4, 384 }
  0x91   : > { %p4583_p13 = scmp.lt.u32.totalorder %s5003_s19, %s5406_s4  ;;  %p4584_p11 = scmp.lt.u32.totalorder %s4582_s20, %s4577_s23 }
  0x92   : > { %p4580_p8 = pnand %p4578_p9, %p4549_p12  ;;  %p4586_p4 = scmp.lt.u32.totalorder %s4577_s23, %s5003_s19 }
  0x93   : > { %p4585_p0 = por %p4584_p11, %p4583_p13 }
  0x94   : > { %p4581_p7 = pneg %p4580_p8 }
  0x95   : > { %p4587_p10 = por %p4586_p4, %p4585_p0 }
  0x97   : > { %p4588_p2 = pnand %p4587_p10, %p4581_p7 }
  0x99   : > { %4591 = shalt.err (!%p4588_p2)
}
  0x9a   : > { %s4592_s30 = scalar_lea.vmem %s318_s14, 64  ;;  %s4719_s16 = smov [#allocation9]  }
  0x9b   : > { %p4593_p3 = scmp.ne.s32.totalorder %s318_s14, %s4592_s30  ;;  %s4597_s12 = sshll.u32 %s4719_s16, 4  ;;  %s4598_s12 = int_to_ptr.vmem [resolvable:$false] %s4597_s12 }
  0x9c   : > { %s4599_s21 = scalar_lea.vmem %s4598_s12, 128  ;;  %p4600_p9 = scmp.lt.s32.totalorder %s318_s14, %s4598_s12 }
  0x9d   : > { %p4595_p5 = pnand %p4593_p3, %p4549_p12  ;;  %p4601_p8 = scmp.lt.s32.totalorder %s4599_s21, %s4592_s30 }
  0x9f   : > { %p4596_p6 = pneg %p4595_p5  ;;  %p4602_p11 = por %p4601_p8, %p4600_p9 }
  0xa1   : > { %p4603_p13 = pnand %p4602_p11, %p4596_p6 }
  0xa3   : > { %4606 = shalt.err (!%p4603_p13)
}
  0xa4   : > { %3896 = dma.hbm_to_vmem [thread:$0]  (!%p4972_p1), %s5003_s19, 64, %s318_s14, %s306_s18  }
  0xa5   : > { %p5441_p7 = scmp.ne.s32.totalorder %s5426_s11, 0 }
  0xa6   : > { %p5442_p0 = scmp.eq.s32.totalorder (!%p5441_p7), %s4796_s8, 0 }
  0xa7   : > { %326 = sbr.rel (%p5441_p7) target bundleno = 1336 (0x538), region = 48 }
  0xae   : > { %4662 = dma.done.wait (%p5442_p0), [#allocation4], 20480   ;;  %p5443_p12 = pmov %p5442_p0 }
  0xaf   : > { %s332_s2 = sand.u32 1, %s4796_s8   ;;  %s334_s27 = sand.u32 1, %s4703_s28  }
  0xb0   : > { %4664 = vsyncadd (%p5443_p12), [#allocation4], 4294946816  ;;  %s3438_s23 = sshll.u32 %s334_s27, 10  ;;  %s333_s7 = scalar_lea.sflag [#allocation7], %s332_s2 }
  0xb1   : > { %s5035_s17 = scalar_lea.vmem [#allocation6], %s3438_s23  ;;  %p5444_p4 = scmp.ne.s32.totalorder %s5424_s9, 0 }
  0xb3   : > { %4666 = dma.done.wait (%p5444_p4), %s333_s7, 16384  }
  0xb4   : > { %4668 = vsyncadd (%p5444_p4), %s333_s7, 4294950912  ;;  %s343_s11 = sand.u32 1, %s4691_s25   ;;  %p5445_p1 = scmp.ne.s32.totalorder %s5425_s10, 0 }
  0xb5   : > { %s3439_s22 = sshll.u32 %s343_s11, 2 }
  0xb6   : > { %s345_s19 = scalar_lea.vmem [#allocation8], %s3439_s22 }
  0xb7   : > { %4670 = dma.done.wait (%p5445_p1), %s333_s7, 64  }
  0xb8   : > { %4672 = vsyncadd (%p5445_p1), %s333_s7, 4294967232  ;;  %s351_s14 = scalar_lea.sflag [#allocation10], %s332_s2  ;;  %s354_s18 = scalar_lea.vmem [#allocation9], %s3439_s22 }
  0xb9   : > { %4674 = dma.done.wait (%p5445_p1), %s351_s14, 64  }
  0xba   : > { %4676 = vsyncadd (%p5445_p1), %s351_s14, 4294967232  ;;  %p5446_p10 = pmov %p5442_p0 }
  0xbb   : > { %p5447_p2 = pmov %p5442_p0 }
  0xbc   : > { %4678 = dma.done.wait (%p5446_p10), [#allocation10], 16  }
  0xbd   : > { %4680 = vsyncadd (%p5447_p2), [#allocation10], 4294967280  ;;  %v5054_v0 = vld [vmem:[%s345_s19] sm:$0xf]  ;;  %v5056_v1 = vld [vmem:[%s354_s18] sm:$0xf] }
  0xbe   : > { %p5448_p3 = scmp.ne.s32.totalorder %s4796_s8, 0 }
  0xbf   : > { %v3968_v2 = vld [vmem:[#allocation3 + $0x4] ss:$16 sps:$4 sm:$0xff] (!%p5448_p3)   ;;  %v3970_v3 = vld [vmem:[#allocation3 + $0xc] ss:$16 sps:$4 sm:$0xff] (!%p5448_p3)   ;;  %v3972_v4 = vld [vmem:[#allocation3] ss:$16 sps:$4 sm:$0xff] (!%p5448_p3)  }
  0xc0   : > { %403 = sbr.rel (%p5448_p3) target bundleno = 633 (0x279), region = 72  ;;  %1385 = vmatprep.subr.bf16.mxu0 (!%p5448_p3), %v3968_v2  ;;  %v3973_v5 = vld [vmem:[#allocation3 + $0x8] ss:$16 sps:$4 sm:$0xff] (!%p5448_p3)   ;;  %1508 = vmatprep.subr.bf16.mxu1 (!%p5448_p3), %v3970_v3  ;;  %v3974_v6 = vld [vmem:[#allocation3 + $0x24] ss:$16 sps:$4 sm:$0xff] (!%p5448_p3)  }
  0xc1   : > { %1386 = vmatpush1.bf16.msra.mxu0 (!%p5448_p3), %v3972_v4  ;;  %1509 = vmatpush1.bf16.msra.mxu1 (!%p5448_p3), %v3973_v5  ;;  %v3976_v7 = vld [vmem:[#allocation3 + $0x2c] ss:$16 sps:$4 sm:$0xff] (!%p5448_p3)   ;;  %v3978_v8 = vld [vmem:[#allocation3 + $0x20] ss:$16 sps:$4 sm:$0xff] (!%p5448_p3)   ;;  %v3979_v9 = vld [vmem:[#allocation3 + $0x28] ss:$16 sps:$4 sm:$0xff] (!%p5448_p3)  }
  0xc2   : > { %1387 = vmatprep.subr.bf16.mxu0 (!%p5448_p3), %v3974_v6  ;;  %1510 = vmatprep.subr.bf16.mxu1 (!%p5448_p3), %v3976_v7  ;;  %v3980_v10 = vld [vmem:[#allocation3 + $0x44] ss:$16 sps:$4 sm:$0xff] (!%p5448_p3)   ;;  %v3982_v11 = vld [vmem:[#allocation3 + $0x4c] ss:$16 sps:$4 sm:$0xff] (!%p5448_p3)   ;;  %v3984_v12 = vld [vmem:[#allocation3 + $0x40] ss:$16 sps:$4 sm:$0xff] (!%p5448_p3)  }
  0xc3   : > { %v3985_v13 = vld [vmem:[#allocation3 + $0x48] ss:$16 sps:$4 sm:$0xff] (!%p5448_p3)   ;;  %v3986_v14 = vld [vmem:[#allocation3 + $0x64] ss:$16 sps:$4 sm:$0xff] (!%p5448_p3)   ;;  %v3988_v15 = vld [vmem:[#allocation3 + $0x6c] ss:$16 sps:$4 sm:$0xff] (!%p5448_p3)  }
  0xc4   : > { %v3990_v16 = vld [vmem:[#allocation3 + $0x60] ss:$16 sps:$4 sm:$0xff] (!%p5448_p3)   ;;  %v3991_v17 = vld [vmem:[#allocation3 + $0x68] ss:$16 sps:$4 sm:$0xff] (!%p5448_p3)   ;;  %v3992_v18 = vld [vmem:[#allocation3 + $0x84] ss:$16 sps:$4 sm:$0xff] (!%p5448_p3)  }
  0xc5   : > { %1388 = vmatpush1.bf16.msra.mxu0 (!%p5448_p3), %v3978_v8  ;;  %1511 = vmatpush1.bf16.msra.mxu1 (!%p5448_p3), %v3979_v9  ;;  %v3994_v19 = vld [vmem:[#allocation3 + $0x8c] ss:$16 sps:$4 sm:$0xff] (!%p5448_p3)   ;;  %v3996_v20 = vld [vmem:[#allocation3 + $0x80] ss:$16 sps:$4 sm:$0xff] (!%p5448_p3)   ;;  %v3997_v21 = vld [vmem:[#allocation3 + $0x88] ss:$16 sps:$4 sm:$0xff] (!%p5448_p3)  }
  0xc6   : > { %1389 = vmatprep.subr.bf16.mxu0 (!%p5448_p3), %v3980_v10  ;;  %1512 = vmatprep.subr.bf16.mxu1 (!%p5448_p3), %v3982_v11  ;;  %v3998_v22 = vld [vmem:[#allocation3 + $0xa4] ss:$16 sps:$4 sm:$0xff] (!%p5448_p3)   ;;  %v4000_v23 = vld [vmem:[#allocation3 + $0xac] ss:$16 sps:$4 sm:$0xff] (!%p5448_p3)   ;;  %v4002_v24 = vld [vmem:[#allocation3 + $0xa0] ss:$16 sps:$4 sm:$0xff] (!%p5448_p3)  }
  0xc7   : > { %v4003_v25 = vld [vmem:[#allocation3 + $0xa8] ss:$16 sps:$4 sm:$0xff]   ;;  %v4004_v26 = vld [vmem:[#allocation3 + $0xc4] ss:$16 sps:$4 sm:$0xff]   ;;  %v4006_v27 = vld [vmem:[#allocation3 + $0xcc] ss:$16 sps:$4 sm:$0xff]  }
  0xc8   : > { %v4008_v28 = vld [vmem:[#allocation3 + $0xc0] ss:$16 sps:$4 sm:$0xff]   ;;  %v4009_v29 = vld [vmem:[#allocation3 + $0xc8] ss:$16 sps:$4 sm:$0xff]   ;;  %v4010_v30 = vld [vmem:[#allocation3 + $0xe4] ss:$16 sps:$4 sm:$0xff]  }
  0xc9   : > { %1390 = vmatpush1.bf16.msra.mxu0 %v3984_v12  ;;  %1513 = vmatpush1.bf16.msra.mxu1 %v3985_v13  ;;  %v4012_v31 = vld [vmem:[#allocation3 + $0xec] ss:$16 sps:$4 sm:$0xff]   ;;  %v4014_v32 = vld [vmem:[#allocation3 + $0xe0] ss:$16 sps:$4 sm:$0xff]   ;;  %v4015_v33 = vld [vmem:[#allocation3 + $0xe8] ss:$16 sps:$4 sm:$0xff]  }
  0xca   : > { %1391 = vmatprep.subr.bf16.mxu0 %v3986_v14  ;;  %1514 = vmatprep.subr.bf16.mxu1 %v3988_v15  ;;  %v4016_v34 = vld [vmem:[#allocation3 + $0x104] ss:$16 sps:$4 sm:$0xff]   ;;  %v4018_v35 = vld [vmem:[#allocation3 + $0x10c] ss:$16 sps:$4 sm:$0xff]   ;;  %v4020_v36 = vld [vmem:[#allocation3 + $0x100] ss:$16 sps:$4 sm:$0xff]  }
  0xcb   : > { %v4021_v37 = vld [vmem:[#allocation3 + $0x108] ss:$16 sps:$4 sm:$0xff]   ;;  %v4022_v38 = vld [vmem:[#allocation3 + $0x124] ss:$16 sps:$4 sm:$0xff]   ;;  %v4024_v39 = vld [vmem:[#allocation3 + $0x12c] ss:$16 sps:$4 sm:$0xff]  }
  0xcc   : > { %v4026_v40 = vld [vmem:[#allocation3 + $0x120] ss:$16 sps:$4 sm:$0xff]   ;;  %v4027_v41 = vld [vmem:[#allocation3 + $0x128] ss:$16 sps:$4 sm:$0xff]   ;;  %v4028_v42 = vld [vmem:[#allocation3 + $0x144] ss:$16 sps:$4 sm:$0xff]  }
  0xcd   : > { %1392 = vmatpush1.bf16.msra.mxu0 %v3990_v16  ;;  %1515 = vmatpush1.bf16.msra.mxu1 %v3991_v17  ;;  %v4030_v43 = vld [vmem:[#allocation3 + $0x14c] ss:$16 sps:$4 sm:$0xff]   ;;  %v4032_v44 = vld [vmem:[#allocation3 + $0x140] ss:$16 sps:$4 sm:$0xff]   ;;  %v4033_v45 = vld [vmem:[#allocation3 + $0x148] ss:$16 sps:$4 sm:$0xff]  }
  0xce   : > { %1393 = vmatprep.subr.bf16.mxu0 %v3992_v18  ;;  %1516 = vmatprep.subr.bf16.mxu1 %v3994_v19  ;;  %v4034_v46 = vld [vmem:[#allocation3 + $0x164] ss:$16 sps:$4 sm:$0xff]   ;;  %v4036_v47 = vld [vmem:[#allocation3 + $0x16c] ss:$16 sps:$4 sm:$0xff]   ;;  %v4038_v49 = vld [vmem:[#allocation3 + $0x160] ss:$16 sps:$4 sm:$0xff]  }
  0xcf   : > { %v404_v48 = vld [vmem:[%s5402_s0] sm:$0xff]  ;;  %v4039_v51 = vld [vmem:[#allocation3 + $0x168] ss:$16 sps:$4 sm:$0xff]   ;;  %v4042_v53 = vld [vmem:[#allocation3 + $0x18c] ss:$16 sps:$4 sm:$0xff]  }
  0xd0   : > { %v3444_v50 = vcombine.high %v404_v48, %v404_v48  ;;  %v4040_v52 = vld [vmem:[#allocation3 + $0x184] ss:$16 sps:$4 sm:$0xff]   ;;  %v4044_v54 = vld [vmem:[#allocation3 + $0x180] ss:$16 sps:$4 sm:$0xff]   ;;  %v4045_v55 = vld [vmem:[#allocation3 + $0x188] ss:$16 sps:$4 sm:$0xff]   ;;  %v3443_v8 = vcombine.low %v404_v48, %v404_v48 }
  0xd1   : > { %1394 = vmatpush1.bf16.msra.mxu0 %v3996_v20  ;;  %1517 = vmatpush1.bf16.msra.mxu1 %v3997_v21  ;;  %v4046_v56 = vld [vmem:[#allocation3 + $0x1a4] ss:$16 sps:$4 sm:$0xff]   ;;  %v4048_v57 = vld [vmem:[#allocation3 + $0x1ac] ss:$16 sps:$4 sm:$0xff]   ;;  %v4050_v58 = vld [vmem:[#allocation3 + $0x1a0] ss:$16 sps:$4 sm:$0xff]  }
  0xd2   : > { %1395 = vmatprep.subr.bf16.mxu0 %v3998_v22  ;;  %1518 = vmatprep.subr.bf16.mxu1 %v4000_v23  ;;  %v4051_v59 = vld [vmem:[#allocation3 + $0x1a8] ss:$16 sps:$4 sm:$0xff]   ;;  %v4052_v60 = vld [vmem:[#allocation3 + $0x1c4] ss:$16 sps:$4 sm:$0xff]   ;;  %v4054_v61 = vld [vmem:[#allocation3 + $0x1cc] ss:$16 sps:$4 sm:$0xff]  }
  0xd3   : > { %1417 = vmatprep.mubr.bf16.mxu0 %v3444_v50  ;;  %1540 = vmatprep.mubr.bf16.mxu1 %v3444_v50  ;;  %v4056_v62 = vld [vmem:[#allocation3 + $0x1c0] ss:$16 sps:$4 sm:$0xff]   ;;  %v4057_v63 = vld [vmem:[#allocation3 + $0x1c8] ss:$16 sps:$4 sm:$0xff]   ;;  %v4058_v2 = vld [vmem:[#allocation3 + $0x1e4] ss:$16 sps:$4 sm:$0xff]  }
  0xd4   : > { %v4060_v3 = vld [vmem:[#allocation3 + $0x1ec] ss:$16 sps:$4 sm:$0xff]   ;;  %v4062_v4 = vld [vmem:[#allocation3 + $0x1e0] ss:$16 sps:$4 sm:$0xff]   ;;  %v4063_v5 = vld [vmem:[#allocation3 + $0x1e8] ss:$16 sps:$4 sm:$0xff]  }
  0xd5   : > { %1396 = vmatpush1.bf16.msra.mxu0 %v4002_v24  ;;  %1519 = vmatpush1.bf16.msra.mxu1 %v4003_v25  ;;  %v4068_v6 = vld [vmem:[#allocation3 + $0x204] ss:$16 sps:$4 sm:$0xff]   ;;  %v4071_v7 = vld [vmem:[#allocation3 + $0x20c] ss:$16 sps:$4 sm:$0xff]   ;;  %v4066_v9 = vld [vmem:[#allocation3 + $0x200] ss:$16 sps:$4 sm:$0xff]  }
  0xd6   : > { %1397 = vmatprep.subr.bf16.mxu0 %v4004_v26  ;;  %1520 = vmatprep.subr.bf16.mxu1 %v4006_v27  ;;  %v4069_v10 = vld [vmem:[#allocation3 + $0x208] ss:$16 sps:$4 sm:$0xff]   ;;  %v4074_v11 = vld [vmem:[#allocation3 + $0x224] ss:$16 sps:$4 sm:$0xff]   ;;  %v4077_v12 = vld [vmem:[#allocation3 + $0x22c] ss:$16 sps:$4 sm:$0xff]  }
  0xd7   : > { %v4072_v13 = vld [vmem:[#allocation3 + $0x220] ss:$16 sps:$4 sm:$0xff]   ;;  %v4075_v14 = vld [vmem:[#allocation3 + $0x228] ss:$16 sps:$4 sm:$0xff]   ;;  %v4080_v15 = vld [vmem:[#allocation3 + $0x244] ss:$16 sps:$4 sm:$0xff]  }
  0xd8   : > { %v4083_v16 = vld [vmem:[#allocation3 + $0x24c] ss:$16 sps:$4 sm:$0xff]   ;;  %v4078_v17 = vld [vmem:[#allocation3 + $0x240] ss:$16 sps:$4 sm:$0xff]   ;;  %v4081_v18 = vld [vmem:[#allocation3 + $0x248] ss:$16 sps:$4 sm:$0xff]  }
  0xd9   : > { %1398 = vmatpush1.bf16.msra.mxu0 %v4008_v28  ;;  %1521 = vmatpush1.bf16.msra.mxu1 %v4009_v29  ;;  %v4086_v19 = vld [vmem:[#allocation3 + $0x264] ss:$16 sps:$4 sm:$0xff]   ;;  %v4089_v20 = vld [vmem:[#allocation3 + $0x26c] ss:$16 sps:$4 sm:$0xff]   ;;  %v4084_v21 = vld [vmem:[#allocation3 + $0x260] ss:$16 sps:$4 sm:$0xff]  }
  0xda   : > { %1399 = vmatprep.subr.bf16.mxu0 %v4010_v30  ;;  %1522 = vmatprep.subr.bf16.mxu1 %v4012_v31  ;;  %v4087_v22 = vld [vmem:[#allocation3 + $0x268] ss:$16 sps:$4 sm:$0xff]   ;;  %v4092_v23 = vld [vmem:[#allocation3 + $0x284] ss:$16 sps:$4 sm:$0xff]   ;;  %v4095_v24 = vld [vmem:[#allocation3 + $0x28c] ss:$16 sps:$4 sm:$0xff]  }
  0xdb   : > { %v4090_v25 = vld [vmem:[#allocation3 + $0x280] ss:$16 sps:$4 sm:$0xff]   ;;  %v4093_v26 = vld [vmem:[#allocation3 + $0x288] ss:$16 sps:$4 sm:$0xff]   ;;  %v4098_v27 = vld [vmem:[#allocation3 + $0x2a4] ss:$16 sps:$4 sm:$0xff]  }
  0xdc   : > { %v4101_v28 = vld [vmem:[#allocation3 + $0x2ac] ss:$16 sps:$4 sm:$0xff]   ;;  %v4096_v29 = vld [vmem:[#allocation3 + $0x2a0] ss:$16 sps:$4 sm:$0xff]   ;;  %v4099_v30 = vld [vmem:[#allocation3 + $0x2a8] ss:$16 sps:$4 sm:$0xff]  }
  0xdd   : > { %1400 = vmatpush1.bf16.msra.mxu0 %v4014_v32  ;;  %1523 = vmatpush1.bf16.msra.mxu1 %v4015_v33  ;;  %v4104_v31 = vld [vmem:[#allocation3 + $0x2c4] ss:$16 sps:$4 sm:$0xff]   ;;  %v4107_v32 = vld [vmem:[#allocation3 + $0x2cc] ss:$16 sps:$4 sm:$0xff]   ;;  %v4123_v48 = vld [vmem:[#allocation3 + $0x328] ss:$16 sps:$4 sm:$0xff]  }
  0xde   : > { %1401 = vmatprep.subr.bf16.mxu0 %v4016_v34  ;;  %1524 = vmatprep.subr.bf16.mxu1 %v4018_v35  ;;  %v5066_v33 = vld [vmem:[%s5402_s0 + $0x8] sm:$0xff]  ;;  %v4102_v35 = vld [vmem:[#allocation3 + $0x2c0] ss:$16 sps:$4 sm:$0xff]  }
  0xdf   : > { %v3446_v34 = vcombine.high %v5066_v33, %v5066_v33  ;;  %v4131_v50 = vld [vmem:[#allocation3 + $0x34c] ss:$16 sps:$4 sm:$0xff]  }
  0xe1   : > { %1402 = vmatpush1.bf16.msra.mxu0 %v4020_v36  ;;  %1525 = vmatpush1.bf16.msra.mxu1 %v4021_v37  ;;  %v4105_v36 = vld [vmem:[#allocation3 + $0x2c8] ss:$16 sps:$4 sm:$0xff]   ;;  %v4110_v37 = vld [vmem:[#allocation3 + $0x2e4] ss:$16 sps:$4 sm:$0xff]  }
  0xe2   : > { %1403 = vmatprep.subr.bf16.mxu0 %v4022_v38  ;;  %1526 = vmatprep.subr.bf16.mxu1 %v4024_v39  ;;  %v4113_v38 = vld [vmem:[#allocation3 + $0x2ec] ss:$16 sps:$4 sm:$0xff]   ;;  %v4108_v39 = vld [vmem:[#allocation3 + $0x2e0] ss:$16 sps:$4 sm:$0xff]  }
  0xe5   : > { %1404 = vmatpush1.bf16.msra.mxu0 %v4026_v40  ;;  %1527 = vmatpush1.bf16.msra.mxu1 %v4027_v41  ;;  %v4111_v40 = vld [vmem:[#allocation3 + $0x2e8] ss:$16 sps:$4 sm:$0xff]   ;;  %v4116_v41 = vld [vmem:[#allocation3 + $0x304] ss:$16 sps:$4 sm:$0xff]  }
  0xe6   : > { %1405 = vmatprep.subr.bf16.mxu0 %v4028_v42  ;;  %1528 = vmatprep.subr.bf16.mxu1 %v4030_v43  ;;  %v4119_v42 = vld [vmem:[#allocation3 + $0x30c] ss:$16 sps:$4 sm:$0xff]   ;;  %v4114_v43 = vld [vmem:[#allocation3 + $0x300] ss:$16 sps:$4 sm:$0xff]  }
  0xe9   : > { %1406 = vmatpush1.bf16.msra.mxu0 %v4032_v44  ;;  %1529 = vmatpush1.bf16.msra.mxu1 %v4033_v45  ;;  %v4117_v44 = vld [vmem:[#allocation3 + $0x308] ss:$16 sps:$4 sm:$0xff]   ;;  %v4122_v45 = vld [vmem:[#allocation3 + $0x324] ss:$16 sps:$4 sm:$0xff]  }
  0xea   : > { %1407 = vmatprep.subr.bf16.mxu0 %v4034_v46  ;;  %1530 = vmatprep.subr.bf16.mxu1 %v4036_v47  ;;  %v4125_v46 = vld [vmem:[#allocation3 + $0x32c] ss:$16 sps:$4 sm:$0xff]   ;;  %v4120_v47 = vld [vmem:[#allocation3 + $0x320] ss:$16 sps:$4 sm:$0xff]  }
  0xed   : > { %1408 = vmatpush1.bf16.msra.mxu0 %v4038_v49  ;;  %1531 = vmatpush1.bf16.msra.mxu1 %v4039_v51  ;;  %v4128_v49 = vld [vmem:[#allocation3 + $0x344] ss:$16 sps:$4 sm:$0xff]   ;;  %v4126_v51 = vld [vmem:[#allocation3 + $0x340] ss:$16 sps:$4 sm:$0xff]  }
  0xee   : > { %1409 = vmatprep.subr.bf16.mxu0 %v4040_v52  ;;  %1532 = vmatprep.subr.bf16.mxu1 %v4042_v53  ;;  %v4129_v52 = vld [vmem:[#allocation3 + $0x348] ss:$16 sps:$4 sm:$0xff]   ;;  %v4134_v53 = vld [vmem:[#allocation3 + $0x364] ss:$16 sps:$4 sm:$0xff]  }
  0xf1   : > { %1410 = vmatpush1.bf16.msra.mxu0 %v4044_v54  ;;  %1533 = vmatpush1.bf16.msra.mxu1 %v4045_v55  ;;  %v4137_v54 = vld [vmem:[#allocation3 + $0x36c] ss:$16 sps:$4 sm:$0xff]   ;;  %v4132_v55 = vld [vmem:[#allocation3 + $0x360] ss:$16 sps:$4 sm:$0xff]  }
  0xf2   : > { %1411 = vmatprep.subr.bf16.mxu0 %v4046_v56  ;;  %1534 = vmatprep.subr.bf16.mxu1 %v4048_v57  ;;  %v4135_v56 = vld [vmem:[#allocation3 + $0x368] ss:$16 sps:$4 sm:$0xff]   ;;  %v4140_v57 = vld [vmem:[#allocation3 + $0x384] ss:$16 sps:$4 sm:$0xff]  }
  0xf5   : > { %1412 = vmatpush1.bf16.msra.mxu0 %v4050_v58  ;;  %1535 = vmatpush1.bf16.msra.mxu1 %v4051_v59  ;;  %v4143_v58 = vld [vmem:[#allocation3 + $0x38c] ss:$16 sps:$4 sm:$0xff]   ;;  %v4138_v59 = vld [vmem:[#allocation3 + $0x380] ss:$16 sps:$4 sm:$0xff]  }
  0xf6   : > { %1413 = vmatprep.subr.bf16.mxu0 %v4052_v60  ;;  %1536 = vmatprep.subr.bf16.mxu1 %v4054_v61  ;;  %v4141_v60 = vld [vmem:[#allocation3 + $0x388] ss:$16 sps:$4 sm:$0xff]   ;;  %v4146_v61 = vld [vmem:[#allocation3 + $0x3a4] ss:$16 sps:$4 sm:$0xff]  }
  0xf9   : > { %1414 = vmatpush1.bf16.msra.mxu0 %v4056_v62  ;;  %1537 = vmatpush1.bf16.msra.mxu1 %v4057_v63  ;;  %v4149_v62 = vld [vmem:[#allocation3 + $0x3ac] ss:$16 sps:$4 sm:$0xff]   ;;  %v4144_v63 = vld [vmem:[#allocation3 + $0x3a0] ss:$16 sps:$4 sm:$0xff]  }
  0xfa   : > { %1415 = vmatprep.subr.bf16.mxu0 %v4058_v2  ;;  %1538 = vmatprep.subr.bf16.mxu1 %v4060_v3  ;;  %v4147_v2 = vld [vmem:[#allocation3 + $0x3a8] ss:$16 sps:$4 sm:$0xff]   ;;  %v4152_v3 = vld [vmem:[#allocation3 + $0x3c4] ss:$16 sps:$4 sm:$0xff]  }
  0xfd   : > { %1416 = vmatpush1.bf16.msra.mxu0 %v4062_v4  ;;  %1539 = vmatpush1.bf16.msra.mxu1 %v4063_v5  ;;  %v4155_v4 = vld [vmem:[#allocation3 + $0x3cc] ss:$16 sps:$4 sm:$0xff]   ;;  %v4150_v5 = vld [vmem:[#allocation3 + $0x3c0] ss:$16 sps:$4 sm:$0xff]  }
  0xfe   : > { %1426 = vmatprep.subr.bf16.mxu0 %v4068_v6  ;;  %1549 = vmatprep.subr.bf16.mxu1 %v4071_v7  ;;  %v4153_v6 = vld [vmem:[#allocation3 + $0x3c8] ss:$16 sps:$4 sm:$0xff]   ;;  %v4158_v7 = vld [vmem:[#allocation3 + $0x3e4] ss:$16 sps:$4 sm:$0xff]  }
 0x100   : > { %1418 = vmatmul.mubr.bf16.vlgmr.msra.gmra.mrb[0].mxu0 %v3443_v8  ;;  %1541 = vmatmul.mubr.bf16.vlgmr.msra.gmra.mrb[0].mxu1 %v3443_v8  ;;  %v4161_v8 = vld [vmem:[#allocation3 + $0x3ec] ss:$16 sps:$4 sm:$0xff]  }
 0x101   : > { %1427 = vmatpush1.bf16.msra.mxu0 %v4066_v9  ;;  %1550 = vmatpush1.bf16.msra.mxu1 %v4069_v10  ;;  %v4156_v9 = vld [vmem:[#allocation3 + $0x3e0] ss:$16 sps:$4 sm:$0xff]   ;;  %v4159_v10 = vld [vmem:[#allocation3 + $0x3e8] ss:$16 sps:$4 sm:$0xff]  }
 0x102   : > { %1428 = vmatprep.subr.bf16.mxu0 %v4074_v11  ;;  %1551 = vmatprep.subr.bf16.mxu1 %v4077_v12  ;;  %v4166_v11 = vld [vmem:[#allocation3 + $0x404] ss:$16 sps:$4 sm:$0xff]   ;;  %v4169_v12 = vld [vmem:[#allocation3 + $0x40c] ss:$16 sps:$4 sm:$0xff]  }
 0x103   : > { %1458 = vmatprep.mubr.bf16.mxu0 %v3446_v34  ;;  %1581 = vmatprep.mubr.bf16.mxu1 %v3446_v34  ;;  %v4199_v34 = vld [vmem:[#allocation3 + $0x4ac] ss:$16 sps:$4 sm:$0xff]  }
 0x105   : > { %1429 = vmatpush1.bf16.msra.mxu0 %v4072_v13  ;;  %1552 = vmatpush1.bf16.msra.mxu1 %v4075_v14  ;;  %v3445_v13 = vcombine.low %v5066_v33, %v5066_v33  ;;  %v4164_v14 = vld [vmem:[#allocation3 + $0x400] ss:$16 sps:$4 sm:$0xff]   ;;  %v4196_v33 = vld [vmem:[#allocation3 + $0x4a4] ss:$16 sps:$4 sm:$0xff]  }
 0x106   : > { %1430 = vmatprep.subr.bf16.mxu0 %v4080_v15  ;;  %1553 = vmatprep.subr.bf16.mxu1 %v4083_v16  ;;  %v4167_v15 = vld [vmem:[#allocation3 + $0x408] ss:$16 sps:$4 sm:$0xff]   ;;  %v4172_v16 = vld [vmem:[#allocation3 + $0x424] ss:$16 sps:$4 sm:$0xff]  }
 0x109   : > { %1431 = vmatpush1.bf16.msra.mxu0 %v4078_v17  ;;  %1554 = vmatpush1.bf16.msra.mxu1 %v4081_v18  ;;  %v4175_v17 = vld [vmem:[#allocation3 + $0x42c] ss:$16 sps:$4 sm:$0xff]   ;;  %v4170_v18 = vld [vmem:[#allocation3 + $0x420] ss:$16 sps:$4 sm:$0xff]  }
 0x10a   : > { %1432 = vmatprep.subr.bf16.mxu0 %v4086_v19  ;;  %1555 = vmatprep.subr.bf16.mxu1 %v4089_v20  ;;  %v4173_v19 = vld [vmem:[#allocation3 + $0x428] ss:$16 sps:$4 sm:$0xff]   ;;  %v4178_v20 = vld [vmem:[#allocation3 + $0x444] ss:$16 sps:$4 sm:$0xff]  }
 0x10d   : > { %1433 = vmatpush1.bf16.msra.mxu0 %v4084_v21  ;;  %1556 = vmatpush1.bf16.msra.mxu1 %v4087_v22  ;;  %v4181_v21 = vld [vmem:[#allocation3 + $0x44c] ss:$16 sps:$4 sm:$0xff]   ;;  %v4720_v22 = vmov 0  }
 0x10e   : > { %1434 = vmatprep.subr.bf16.mxu0 %v4092_v23  ;;  %1557 = vmatprep.subr.bf16.mxu1 %v4095_v24  ;;  %v4176_v23 = vld [vmem:[#allocation3 + $0x440] ss:$16 sps:$4 sm:$0xff]   ;;  %v4179_v24 = vld [vmem:[#allocation3 + $0x448] ss:$16 sps:$4 sm:$0xff]  }
 0x111   : > { %1435 = vmatpush1.bf16.msra.mxu0 %v4090_v25  ;;  %1558 = vmatpush1.bf16.msra.mxu1 %v4093_v26  ;;  %v4184_v25 = vld [vmem:[#allocation3 + $0x464] ss:$16 sps:$4 sm:$0xff]   ;;  %v4187_v26 = vld [vmem:[#allocation3 + $0x46c] ss:$16 sps:$4 sm:$0xff]  }
 0x112   : > { %1436 = vmatprep.subr.bf16.mxu0 %v4098_v27  ;;  %1559 = vmatprep.subr.bf16.mxu1 %v4101_v28  ;;  %v4182_v27 = vld [vmem:[#allocation3 + $0x460] ss:$16 sps:$4 sm:$0xff]   ;;  %v4185_v28 = vld [vmem:[#allocation3 + $0x468] ss:$16 sps:$4 sm:$0xff]  }
 0x115   : > { %1437 = vmatpush1.bf16.msra.mxu0 %v4096_v29  ;;  %1560 = vmatpush1.bf16.msra.mxu1 %v4099_v30  ;;  %v4190_v29 = vld [vmem:[#allocation3 + $0x484] ss:$16 sps:$4 sm:$0xff]   ;;  %v4193_v30 = vld [vmem:[#allocation3 + $0x48c] ss:$16 sps:$4 sm:$0xff]  }
 0x116   : > { %1438 = vmatprep.subr.bf16.mxu0 %v4104_v31  ;;  %1561 = vmatprep.subr.bf16.mxu1 %v4107_v32  ;;  %v4188_v31 = vld [vmem:[#allocation3 + $0x480] ss:$16 sps:$4 sm:$0xff]   ;;  %v4191_v32 = vld [vmem:[#allocation3 + $0x488] ss:$16 sps:$4 sm:$0xff]  }
 0x119   : > { %1439 = vmatpush1.bf16.msra.mxu0 %v4102_v35  ;;  %1562 = vmatpush1.bf16.msra.mxu1 %v4105_v36  ;;  %v4194_v35 = vld [vmem:[#allocation3 + $0x4a0] ss:$16 sps:$4 sm:$0xff]   ;;  %v4197_v36 = vld [vmem:[#allocation3 + $0x4a8] ss:$16 sps:$4 sm:$0xff]  }
 0x11a   : > { %1440 = vmatprep.subr.bf16.mxu0 %v4110_v37  ;;  %1563 = vmatprep.subr.bf16.mxu1 %v4113_v38  ;;  %v4202_v37 = vld [vmem:[#allocation3 + $0x4c4] ss:$16 sps:$4 sm:$0xff]   ;;  %v4205_v38 = vld [vmem:[#allocation3 + $0x4cc] ss:$16 sps:$4 sm:$0xff]  }
 0x11d   : > { %1441 = vmatpush1.bf16.msra.mxu0 %v4108_v39  ;;  %1564 = vmatpush1.bf16.msra.mxu1 %v4111_v40  ;;  %v4200_v39 = vld [vmem:[#allocation3 + $0x4c0] ss:$16 sps:$4 sm:$0xff]   ;;  %v4203_v40 = vld [vmem:[#allocation3 + $0x4c8] ss:$16 sps:$4 sm:$0xff]  }
 0x11e   : > { %1442 = vmatprep.subr.bf16.mxu0 %v4116_v41  ;;  %1565 = vmatprep.subr.bf16.mxu1 %v4119_v42  ;;  %v4208_v41 = vld [vmem:[#allocation3 + $0x4e4] ss:$16 sps:$4 sm:$0xff]   ;;  %v4211_v42 = vld [vmem:[#allocation3 + $0x4ec] ss:$16 sps:$4 sm:$0xff]  }
 0x121   : > { %1443 = vmatpush1.bf16.msra.mxu0 %v4114_v43  ;;  %1566 = vmatpush1.bf16.msra.mxu1 %v4117_v44  ;;  %v4206_v43 = vld [vmem:[#allocation3 + $0x4e0] ss:$16 sps:$4 sm:$0xff]   ;;  %v4209_v44 = vld [vmem:[#allocation3 + $0x4e8] ss:$16 sps:$4 sm:$0xff]  }
 0x122   : > { %1444 = vmatprep.subr.bf16.mxu0 %v4122_v45  ;;  %1567 = vmatprep.subr.bf16.mxu1 %v4125_v46  ;;  %v4212_v45 = vld [vmem:[%s5402_s0 + $0x10] ss:$0 sps:$4 sm:$0xff]  }
 0x125   : > { %1445 = vmatpush1.bf16.msra.mxu0 %v4120_v47  ;;  %1568 = vmatpush1.bf16.msra.mxu1 %v4123_v48 }
 0x126   : > { %1446 = vmatprep.subr.bf16.mxu0 %v4128_v49  ;;  %1569 = vmatprep.subr.bf16.mxu1 %v4131_v50 }
 0x129   : > { %1447 = vmatpush1.bf16.msra.mxu0 %v4126_v51  ;;  %1570 = vmatpush1.bf16.msra.mxu1 %v4129_v52 }
 0x12a   : > { %1448 = vmatprep.subr.bf16.mxu0 %v4134_v53  ;;  %1571 = vmatprep.subr.bf16.mxu1 %v4137_v54 }
 0x12d   : > { %1449 = vmatpush1.bf16.msra.mxu0 %v4132_v55  ;;  %1572 = vmatpush1.bf16.msra.mxu1 %v4135_v56 }
 0x12e   : > { %1450 = vmatprep.subr.bf16.mxu0 %v4140_v57  ;;  %1573 = vmatprep.subr.bf16.mxu1 %v4143_v58 }
 0x131   : > { %1451 = vmatpush1.bf16.msra.mxu0 %v4138_v59  ;;  %1574 = vmatpush1.bf16.msra.mxu1 %v4141_v60 }
 0x132   : > { %1452 = vmatprep.subr.bf16.mxu0 %v4146_v61  ;;  %1575 = vmatprep.subr.bf16.mxu1 %v4149_v62 }
 0x135   : > { %1453 = vmatpush1.bf16.msra.mxu0 %v4144_v63  ;;  %1576 = vmatpush1.bf16.msra.mxu1 %v4147_v2 }
 0x136   : > { %1454 = vmatprep.subr.bf16.mxu0 %v4152_v3  ;;  %1577 = vmatprep.subr.bf16.mxu1 %v4155_v4 }
 0x139   : > { %1455 = vmatpush1.bf16.msra.mxu0 %v4150_v5  ;;  %1578 = vmatpush1.bf16.msra.mxu1 %v4153_v6 }
 0x13a   : > { %1456 = vmatprep.subr.bf16.mxu0 %v4158_v7  ;;  %1579 = vmatprep.subr.bf16.mxu1 %v4161_v8 }
 0x13d   : > { %1457 = vmatpush1.bf16.msra.mxu0 %v4156_v9  ;;  %1580 = vmatpush1.bf16.msra.mxu1 %v4159_v10 }
 0x13e   : > { %1467 = vmatprep.subr.bf16.mxu0 %v4166_v11  ;;  %1590 = vmatprep.subr.bf16.mxu1 %v4169_v12 }
 0x140   : > { %1459 = vmatmul.mubr.bf16.vlgmr.msra.gmra.mrb[0].mxu0 %v3445_v13  ;;  %1582 = vmatmul.mubr.bf16.vlgmr.msra.gmra.mrb[0].mxu1 %v3445_v13 }
 0x141   : > { %1468 = vmatpush1.bf16.msra.mxu0 %v4164_v14  ;;  %1591 = vmatpush1.bf16.msra.mxu1 %v4167_v15 }
 0x142   : > { %1469 = vmatprep.subr.bf16.mxu0 %v4172_v16  ;;  %1592 = vmatprep.subr.bf16.mxu1 %v4175_v17 }
 0x143   : > { %1499 = vmatprep.mubr.bf16.mxu0 %v4720_v22  ;;  %1622 = vmatprep.mubr.bf16.mxu1 %v4720_v22 }
 0x145   : > { %1470 = vmatpush1.bf16.msra.mxu0 %v4170_v18  ;;  %1593 = vmatpush1.bf16.msra.mxu1 %v4173_v19 }
 0x146   : > { %1471 = vmatprep.subr.bf16.mxu0 %v4178_v20  ;;  %1594 = vmatprep.subr.bf16.mxu1 %v4181_v21 }
 0x149   : > { %1472 = vmatpush1.bf16.msra.mxu0 %v4176_v23  ;;  %1595 = vmatpush1.bf16.msra.mxu1 %v4179_v24 }
 0x14a   : > { %1473 = vmatprep.subr.bf16.mxu0 %v4184_v25  ;;  %1596 = vmatprep.subr.bf16.mxu1 %v4187_v26 }
 0x14d   : > { %1474 = vmatpush1.bf16.msra.mxu0 %v4182_v27  ;;  %1597 = vmatpush1.bf16.msra.mxu1 %v4185_v28 }
 0x14e   : > { %1475 = vmatprep.subr.bf16.mxu0 %v4190_v29  ;;  %1598 = vmatprep.subr.bf16.mxu1 %v4193_v30 }
 0x151   : > { %1476 = vmatpush1.bf16.msra.mxu0 %v4188_v31  ;;  %1599 = vmatpush1.bf16.msra.mxu1 %v4191_v32 }
 0x152   : > { %1477 = vmatprep.subr.bf16.mxu0 %v4196_v33  ;;  %1600 = vmatprep.subr.bf16.mxu1 %v4199_v34 }
 0x155   : > { %1478 = vmatpush1.bf16.msra.mxu0 %v4194_v35  ;;  %1601 = vmatpush1.bf16.msra.mxu1 %v4197_v36 }
 0x156   : > { %1479 = vmatprep.subr.bf16.mxu0 %v4202_v37  ;;  %1602 = vmatprep.subr.bf16.mxu1 %v4205_v38 }
 0x159   : > { %1480 = vmatpush1.bf16.msra.mxu0 %v4200_v39  ;;  %1603 = vmatpush1.bf16.msra.mxu1 %v4203_v40 }
 0x15a   : > { %1481 = vmatprep.subr.bf16.mxu0 %v4208_v41  ;;  %1604 = vmatprep.subr.bf16.mxu1 %v4211_v42 }
 0x15d   : > { %1482 = vmatpush1.bf16.msra.mxu0 %v4206_v43  ;;  %1605 = vmatpush1.bf16.msra.mxu1 %v4209_v44 }
 0x160   : > { %1500 = vmatmul.mubr.bf16.vlgmr.msra.gmra.mrb[0].mxu0 %v4212_v45  ;;  %1623 = vmatmul.mubr.bf16.vlgmr.msra.gmra.mrb[0].mxu1 %v4212_v45 }
 0x233   : > { %v1501_v46 = vpop.f32.mrb[0].mxu0  ;;  %v1624_v47 = vpop.f32.mrb[0].mxu1 }
 0x234   : > { %v1631_v48 = vrot.slane %v1501_v46, 4  ;;  %v1643_v49 = vrot.slane %v1624_v47, 4  ;;  %v1503_v50 = vpop.f32.mrb[1].mxu0  ;;  %v1626_v51 = vpop.f32.mrb[1].mxu1 }
 0x235   : > { %v1637_v52 = vrot.slane %v1503_v50, 4  ;;  %v1649_v53 = vrot.slane %v1626_v51, 4  ;;  %v1505_v54 = vpop.f32.mrb[2].mxu0  ;;  %v1628_v55 = vpop.f32.mrb[2].mxu1 }
 0x236   : > { %v1632_v56 = vadd.f32 %v1631_v48, %v1501_v46  ;;  %v1644_v57 = vadd.f32 %v1643_v49, %v1624_v47  ;;  %v1506_v58 = vpop.f32.mrb[3].mxu0  ;;  %v1629_v59 = vpop.f32.mrb[3].mxu1 }
 0x237   : > { %v1638_v60 = vadd.f32 %v1637_v52, %v1503_v50  ;;  %v1650_v61 = vadd.f32 %v1649_v53, %v1626_v51 }
 0x238   : > { %v1633_v62 = vrot.slane %v1632_v56, 2  ;;  %v1645_v63 = vrot.slane %v1644_v57, 2 }
 0x239   : > { %v1639_v2 = vrot.slane %v1638_v60, 2  ;;  %v1651_v3 = vrot.slane %v1650_v61, 2 }
 0x23a   : > { %v1634_v4 = vadd.f32 %v1633_v62, %v1632_v56  ;;  %v1646_v5 = vadd.f32 %v1645_v63, %v1644_v57  ;;  %v1713_v62 = vlaneseq }
 0x23b   : > { %v1640_v6 = vadd.f32 %v1639_v2, %v1638_v60  ;;  %v1652_v7 = vadd.f32 %v1651_v3, %v1650_v61  ;;  %v4721_v60 = vmov 1966171168  }
 0x23c   : > { %v1635_v8 = vrot.slane %v1634_v4, 1  ;;  %v1647_v9 = vrot.slane %v1646_v5, 1  ;;  %v1711_v61 = vunpack.c.l.s4 %v4721_v60  ;;  %v1714_v2 = vshrl.u32 %v1713_v62, 7 }
 0x23d   : > { %v1641_v10 = vrot.slane %v1640_v6, 1  ;;  %v1653_v11 = vrot.slane %v1652_v7, 1 }
 0x23e   : > { %v1636_v12 = vadd.f32 %v1635_v8, %v1634_v4  ;;  %v1648_v13 = vadd.f32 %v1647_v9, %v1646_v5  ;;  %v1712_v63 = vunpack.c.0.s8 %v1711_v61 }
 0x23f   : > { %v1642_v14 = vadd.f32 %v1641_v10, %v1640_v6  ;;  %v1654_v15 = vadd.f32 %v1653_v11, %v1652_v7 }
 0x240   : > { %v1656_v16 = vmul.f32 0.125, %v1636_v12  ;;  %v1658_v17 = vmul.f32 0.125, %v1648_v13  ;;  %v1715_v5 = vsub.s32 %v1712_v63, %v1714_v2  ;;  %v1737_v13 = vsub.s32 0, %v1714_v2 }
 0x241   : > { %v1657_v18 = vmul.f32 0.125, %v1642_v14  ;;  %v1659_v19 = vmul.f32 0.125, %v1654_v15  ;;  %v1741_v15 = vsub.s32 1, %v1714_v2 }
 0x242   : > { %v5075_v20 = vsub.f32 %v1501_v46, %v1656_v16  ;;  %v5077_v21 = vsub.f32 %v1624_v47, %v1658_v17  ;;  %v1745_v16 = vsub.s32 2, %v1714_v2  ;;  %v1749_v17 = vsub.s32 3, %v1714_v2 }
 0x243   : > { %v5079_v22 = vsub.f32 %v1503_v50, %v1657_v18  ;;  %v5081_v23 = vsub.f32 %v1626_v51, %v1659_v19  ;;  %v1763_v19 = vrot.slane %v5056_v1, %v1737_v13 }
 0x244   : > { %v1664_v24 = vmul.f32 %v5075_v20, %v5075_v20  ;;  %v1666_v25 = vmul.f32 %v5077_v21, %v5077_v21 }
 0x245   : > { %v1665_v26 = vmul.f32 %v5079_v22, %v5079_v22  ;;  %v1667_v27 = vmul.f32 %v5081_v23, %v5081_v23 }
 0x246   : > { %v1668_v28 = vrot.slane %v1664_v24, 4  ;;  %v1680_v29 = vrot.slane %v1666_v25, 4 }
 0x247   : > { %v1674_v30 = vrot.slane %v1665_v26, 4  ;;  %v1686_v31 = vrot.slane %v1667_v27, 4 }
 0x248   : > { %v1669_v32 = vadd.f32 %v1668_v28, %v1664_v24  ;;  %v1681_v33 = vadd.f32 %v1680_v29, %v1666_v25  ;;  %v1767_v24 = vrot.slane %v5056_v1, %v1741_v15  ;;  %v1771_v25 = vrot.slane %v5056_v1, %v1745_v16 }
 0x249   : > { %v1675_v34 = vadd.f32 %v1674_v30, %v1665_v26  ;;  %v1687_v35 = vadd.f32 %v1686_v31, %v1667_v27  ;;  %v1775_v26 = vrot.slane %v5056_v1, %v1749_v17 }
 0x24a   : > { %v1670_v36 = vrot.slane %v1669_v32, 2  ;;  %v1682_v37 = vrot.slane %v1681_v33, 2 }
 0x24b   : > { %v1676_v38 = vrot.slane %v1675_v34, 2  ;;  %v1688_v39 = vrot.slane %v1687_v35, 2 }
 0x24c   : > { %v1671_v40 = vadd.f32 %v1670_v36, %v1669_v32  ;;  %v1683_v41 = vadd.f32 %v1682_v37, %v1681_v33 }
 0x24d   : > { %v1677_v42 = vadd.f32 %v1676_v38, %v1675_v34  ;;  %v1689_v43 = vadd.f32 %v1688_v39, %v1687_v35 }
 0x24e   : > { %v1672_v44 = vrot.slane %v1671_v40, 1  ;;  %v1684_v45 = vrot.slane %v1683_v41, 1 }
 0x24f   : > { %v1678_v46 = vrot.slane %v1677_v42, 1  ;;  %v1690_v47 = vrot.slane %v1689_v43, 1 }
 0x250   : > { %v1673_v48 = vadd.f32 %v1672_v44, %v1671_v40  ;;  %v1685_v49 = vadd.f32 %v1684_v45, %v1683_v41 }
 0x251   : > { %v1679_v50 = vadd.f32 %v1678_v46, %v1677_v42  ;;  %v1691_v51 = vadd.f32 %v1690_v47, %v1689_v43 }
 0x252   : > { %v1692_v52 = vmul.f32 0.125, %v1673_v48  ;;  %v1694_v53 = vmul.f32 0.125, %v1685_v49 }
 0x253   : > { %v1693_v54 = vmul.f32 0.125, %v1679_v50  ;;  %v1695_v55 = vmul.f32 0.125, %v1691_v51 }
 0x254   : > { %v1696_v56 = vadd.f32 1e-05, %v1692_v52  ;;  %v1698_v57 = vadd.f32 1e-05, %v1694_v53 }
 0x255   : > { %v1697_v58 = vadd.f32 1e-05, %v1693_v54  ;;  %v1699_v59 = vadd.f32 1e-05, %v1695_v55 }
 0x256   : > { %4213 = vrsqrt.f32 %v1696_v56 }
 0x257   : > { %4215 = vrsqrt.f32 %v1698_v57 }
 0x258   : > { %4217 = vrsqrt.f32 %v1697_v58 }
 0x259   : > { %4219 = vrsqrt.f32 %v1699_v59 }
 0x260   : > { %v4214_v3 = vpop.eup %4213 }
 0x261   : > { %v4216_v4 = vpop.eup %4215 }
 0x262   : > { %v4218_v6 = vpop.eup %4217 }
 0x263   : > { %v4220_v7 = vpop.eup %4219  ;;  %v1708_v8 = vcombine.low %v4214_v3, %v4218_v6 }
 0x264   : > { %v1709_v9 = vcombine.low %v4216_v4, %v4220_v7 }
 0x265   : > { %v1716_v10 = vrot.slane %v1708_v8, %v1715_v5 }
 0x266   : > { %v1723_v11 = vrot.slane %v1709_v9, %v1715_v5 }
 0x268   : > { %v1724_v12 = vcombine.low %v1716_v10, %v1723_v11 }
 0x26a   : > { %v1731_v14 = vrot.slane %v1724_v12, %v1715_v5 }
 0x26c   : > { %v1733_v18 = vmul.f32 %v1731_v14, %v5054_v0 }
 0x26e   : > { %v1738_v27 = vrot.slane %v1733_v18, %v1737_v13  ;;  %v1742_v28 = vrot.slane %v1733_v18, %v1741_v15  ;;  %v1746_v29 = vrot.slane %v1733_v18, %v1745_v16  ;;  %v1750_v30 = vrot.slane %v1733_v18, %v1749_v17 }
 0x270   : > { %v1755_v31 = vmul.f32 %v1738_v27, %v5075_v20  ;;  %v1756_v32 = vmul.f32 %v1742_v28, %v5079_v22  ;;  %v1757_v33 = vmul.f32 %v1746_v29, %v5077_v21  ;;  %v1758_v34 = vmul.f32 %v1750_v30, %v5081_v23 }
 0x272   : > { %v1780_v35 = vadd.f32 %v1763_v19, %v1755_v31  ;;  %v1781_v36 = vadd.f32 %v1767_v24, %v1756_v32  ;;  %v1782_v37 = vadd.f32 %v1771_v25, %v1757_v33  ;;  %v1783_v38 = vadd.f32 %v1775_v26, %v1758_v34 }
 0x274   : > { %v1784_v39 = vmax.f32 %v1780_v35, 0.0  ;;  %v1785_v40 = vmax.f32 %v1781_v36, 0.0  ;;  %v1786_v41 = vmax.f32 %v1782_v37, 0.0  ;;  %v1787_v42 = vmax.f32 %v1783_v38, 0.0 }
 0x276   : > { %v3790_v43 = vpack.c.bf16 %v1785_v40, %v1784_v39  ;;  %v3791_v44 = vpack.c.bf16 %v1787_v42, %v1786_v41 }
 0x278   : > { %1804 = vst [vmem:[#allocation2] sm:$0xff] %v3790_v43  ;;  %1805 = vst [vmem:[#allocation2 + $0x8] sm:$0xff] %v3791_v44 }
 0x279 PF: > { %p3610_p5 = scmp.le.s32.totalorder %s4796_s8, 0 }
 0x27a   : > { %v4221_v20 = vld [vmem:[%s5035_s17 + $0x4] ss:$16 sps:$4 sm:$0xff] (!%p3610_p5)   ;;  %v4223_v21 = vld [vmem:[%s5035_s17 + $0xc] ss:$16 sps:$4 sm:$0xff] (!%p3610_p5)   ;;  %v4225_v22 = vld [vmem:[%s5035_s17] ss:$16 sps:$4 sm:$0xff] (!%p3610_p5)  }
 0x27b   : > { %1809 = sbr.rel (%p3610_p5) target bundleno = 1044 (0x414), region = 76  ;;  %2594 = vmatprep.subr.bf16.mxu0 (!%p3610_p5), %v4221_v20  ;;  %v4226_v23 = vld [vmem:[%s5035_s17 + $0x8] ss:$16 sps:$4 sm:$0xff] (!%p3610_p5)   ;;  %2676 = vmatprep.subr.bf16.mxu1 (!%p3610_p5), %v4223_v21  ;;  %v4227_v45 = vld [vmem:[%s5035_s17 + $0x24] ss:$16 sps:$4 sm:$0xff] (!%p3610_p5)  }
 0x27c   : > { %2595 = vmatpush1.bf16.msra.mxu0 (!%p3610_p5), %v4225_v22  ;;  %2677 = vmatpush1.bf16.msra.mxu1 (!%p3610_p5), %v4226_v23  ;;  %v4229_v46 = vld [vmem:[%s5035_s17 + $0x2c] ss:$16 sps:$4 sm:$0xff] (!%p3610_p5)   ;;  %v4231_v47 = vld [vmem:[%s5035_s17 + $0x20] ss:$16 sps:$4 sm:$0xff] (!%p3610_p5)   ;;  %v4232_v48 = vld [vmem:[%s5035_s17 + $0x28] ss:$16 sps:$4 sm:$0xff] (!%p3610_p5)  }
 0x27d   : > { %2596 = vmatprep.subr.bf16.mxu0 (!%p3610_p5), %v4227_v45  ;;  %2678 = vmatprep.subr.bf16.mxu1 (!%p3610_p5), %v4229_v46  ;;  %v4233_v49 = vld [vmem:[%s5035_s17 + $0x44] ss:$16 sps:$4 sm:$0xff] (!%p3610_p5)   ;;  %v4235_v50 = vld [vmem:[%s5035_s17 + $0x4c] ss:$16 sps:$4 sm:$0xff] (!%p3610_p5)   ;;  %v4237_v51 = vld [vmem:[%s5035_s17 + $0x40] ss:$16 sps:$4 sm:$0xff] (!%p3610_p5)  }
 0x27e   : > { %v4238_v52 = vld [vmem:[%s5035_s17 + $0x48] ss:$16 sps:$4 sm:$0xff] (!%p3610_p5)   ;;  %v4239_v53 = vld [vmem:[%s5035_s17 + $0x64] ss:$16 sps:$4 sm:$0xff] (!%p3610_p5)   ;;  %v4241_v54 = vld [vmem:[%s5035_s17 + $0x6c] ss:$16 sps:$4 sm:$0xff] (!%p3610_p5)  }
 0x27f   : > { %v4243_v55 = vld [vmem:[%s5035_s17 + $0x60] ss:$16 sps:$4 sm:$0xff] (!%p3610_p5)   ;;  %v4244_v56 = vld [vmem:[%s5035_s17 + $0x68] ss:$16 sps:$4 sm:$0xff] (!%p3610_p5)   ;;  %v4245_v57 = vld [vmem:[%s5035_s17 + $0x84] ss:$16 sps:$4 sm:$0xff] (!%p3610_p5)  }
 0x280   : > { %2597 = vmatpush1.bf16.msra.mxu0 (!%p3610_p5), %v4231_v47  ;;  %2679 = vmatpush1.bf16.msra.mxu1 (!%p3610_p5), %v4232_v48  ;;  %v4247_v58 = vld [vmem:[%s5035_s17 + $0x8c] ss:$16 sps:$4 sm:$0xff] (!%p3610_p5)   ;;  %v4249_v59 = vld [vmem:[%s5035_s17 + $0x80] ss:$16 sps:$4 sm:$0xff] (!%p3610_p5)   ;;  %v4250_v60 = vld [vmem:[%s5035_s17 + $0x88] ss:$16 sps:$4 sm:$0xff] (!%p3610_p5)  }
 0x281   : > { %2598 = vmatprep.subr.bf16.mxu0 (!%p3610_p5), %v4233_v49  ;;  %2680 = vmatprep.subr.bf16.mxu1 (!%p3610_p5), %v4235_v50  ;;  %v4251_v61 = vld [vmem:[%s5035_s17 + $0xa4] ss:$16 sps:$4 sm:$0xff] (!%p3610_p5)   ;;  %v4253_v62 = vld [vmem:[%s5035_s17 + $0xac] ss:$16 sps:$4 sm:$0xff] (!%p3610_p5)   ;;  %v4255_v63 = vld [vmem:[%s5035_s17 + $0xa0] ss:$16 sps:$4 sm:$0xff] (!%p3610_p5)  }
 0x282   : > { %v4256_v2 = vld [vmem:[%s5035_s17 + $0xa8] ss:$16 sps:$4 sm:$0xff]   ;;  %v4257_v3 = vld [vmem:[%s5035_s17 + $0xc4] ss:$16 sps:$4 sm:$0xff]   ;;  %v4259_v4 = vld [vmem:[%s5035_s17 + $0xcc] ss:$16 sps:$4 sm:$0xff]  }
 0x283   : > { %v4261_v5 = vld [vmem:[%s5035_s17 + $0xc0] ss:$16 sps:$4 sm:$0xff]   ;;  %v4262_v6 = vld [vmem:[%s5035_s17 + $0xc8] ss:$16 sps:$4 sm:$0xff]   ;;  %v4263_v7 = vld [vmem:[%s5035_s17 + $0xe4] ss:$16 sps:$4 sm:$0xff]  }
 0x284   : > { %2599 = vmatpush1.bf16.msra.mxu0 %v4237_v51  ;;  %2681 = vmatpush1.bf16.msra.mxu1 %v4238_v52  ;;  %v4265_v8 = vld [vmem:[%s5035_s17 + $0xec] ss:$16 sps:$4 sm:$0xff]   ;;  %v4267_v9 = vld [vmem:[%s5035_s17 + $0xe0] ss:$16 sps:$4 sm:$0xff]   ;;  %v4268_v10 = vld [vmem:[%s5035_s17 + $0xe8] ss:$16 sps:$4 sm:$0xff]  }
 0x285   : > { %2600 = vmatprep.subr.bf16.mxu0 %v4239_v53  ;;  %2682 = vmatprep.subr.bf16.mxu1 %v4241_v54  ;;  %v4269_v11 = vld [vmem:[%s5035_s17 + $0x104] ss:$16 sps:$4 sm:$0xff]   ;;  %v4271_v12 = vld [vmem:[%s5035_s17 + $0x10c] ss:$16 sps:$4 sm:$0xff]   ;;  %v4273_v13 = vld [vmem:[%s5035_s17 + $0x100] ss:$16 sps:$4 sm:$0xff]  }
 0x286   : > { %v4274_v14 = vld [vmem:[%s5035_s17 + $0x108] ss:$16 sps:$4 sm:$0xff]   ;;  %v4275_v15 = vld [vmem:[%s5035_s17 + $0x124] ss:$16 sps:$4 sm:$0xff]   ;;  %v4277_v16 = vld [vmem:[%s5035_s17 + $0x12c] ss:$16 sps:$4 sm:$0xff]  }
 0x287   : > { %v4279_v17 = vld [vmem:[%s5035_s17 + $0x120] ss:$16 sps:$4 sm:$0xff]   ;;  %v4280_v18 = vld [vmem:[%s5035_s17 + $0x128] ss:$16 sps:$4 sm:$0xff]   ;;  %v4281_v19 = vld [vmem:[%s5035_s17 + $0x144] ss:$16 sps:$4 sm:$0xff]  }
 0x288   : > { %2601 = vmatpush1.bf16.msra.mxu0 %v4243_v55  ;;  %2683 = vmatpush1.bf16.msra.mxu1 %v4244_v56  ;;  %v4283_v24 = vld [vmem:[%s5035_s17 + $0x14c] ss:$16 sps:$4 sm:$0xff]   ;;  %v4285_v25 = vld [vmem:[%s5035_s17 + $0x140] ss:$16 sps:$4 sm:$0xff]   ;;  %v4286_v26 = vld [vmem:[%s5035_s17 + $0x148] ss:$16 sps:$4 sm:$0xff]  }
 0x289   : > { %2602 = vmatprep.subr.bf16.mxu0 %v4245_v57  ;;  %2684 = vmatprep.subr.bf16.mxu1 %v4247_v58  ;;  %v4287_v27 = vld [vmem:[%s5035_s17 + $0x164] ss:$16 sps:$4 sm:$0xff]   ;;  %v4289_v28 = vld [vmem:[%s5035_s17 + $0x16c] ss:$16 sps:$4 sm:$0xff]   ;;  %v4291_v30 = vld [vmem:[%s5035_s17 + $0x160] ss:$16 sps:$4 sm:$0xff]  }
 0x28a   : > { %v1810_v29 = vld [vmem:[#allocation2] sm:$0xff]  ;;  %v4292_v32 = vld [vmem:[%s5035_s17 + $0x168] ss:$16 sps:$4 sm:$0xff]   ;;  %v4295_v34 = vld [vmem:[%s5035_s17 + $0x18c] ss:$16 sps:$4 sm:$0xff]  }
 0x28b   : > { %v3612_v31 = vcombine.high %v1810_v29, %v1810_v29  ;;  %v4293_v33 = vld [vmem:[%s5035_s17 + $0x184] ss:$16 sps:$4 sm:$0xff]   ;;  %v4297_v35 = vld [vmem:[%s5035_s17 + $0x180] ss:$16 sps:$4 sm:$0xff]   ;;  %v4298_v36 = vld [vmem:[%s5035_s17 + $0x188] ss:$16 sps:$4 sm:$0xff]   ;;  %v3611_v48 = vcombine.low %v1810_v29, %v1810_v29 }
 0x28c   : > { %2603 = vmatpush1.bf16.msra.mxu0 %v4249_v59  ;;  %2685 = vmatpush1.bf16.msra.mxu1 %v4250_v60  ;;  %v4299_v37 = vld [vmem:[%s5035_s17 + $0x1a4] ss:$16 sps:$4 sm:$0xff]   ;;  %v4301_v38 = vld [vmem:[%s5035_s17 + $0x1ac] ss:$16 sps:$4 sm:$0xff]   ;;  %v4303_v39 = vld [vmem:[%s5035_s17 + $0x1a0] ss:$16 sps:$4 sm:$0xff]  }
 0x28d   : > { %2604 = vmatprep.subr.bf16.mxu0 %v4251_v61  ;;  %2686 = vmatprep.subr.bf16.mxu1 %v4253_v62  ;;  %v4304_v40 = vld [vmem:[%s5035_s17 + $0x1a8] ss:$16 sps:$4 sm:$0xff]   ;;  %v4305_v41 = vld [vmem:[%s5035_s17 + $0x1c4] ss:$16 sps:$4 sm:$0xff]   ;;  %v4307_v42 = vld [vmem:[%s5035_s17 + $0x1cc] ss:$16 sps:$4 sm:$0xff]  }
 0x28e   : > { %2626 = vmatprep.mubr.bf16.mxu0 %v3612_v31  ;;  %2708 = vmatprep.mubr.bf16.mxu1 %v3612_v31  ;;  %v4309_v43 = vld [vmem:[%s5035_s17 + $0x1c0] ss:$16 sps:$4 sm:$0xff]   ;;  %v4310_v44 = vld [vmem:[%s5035_s17 + $0x1c8] ss:$16 sps:$4 sm:$0xff]   ;;  %v4311_v20 = vld [vmem:[%s5035_s17 + $0x1e4] ss:$16 sps:$4 sm:$0xff]  }
 0x28f   : > { %v4313_v21 = vld [vmem:[%s5035_s17 + $0x1ec] ss:$16 sps:$4 sm:$0xff]   ;;  %v4315_v22 = vld [vmem:[%s5035_s17 + $0x1e0] ss:$16 sps:$4 sm:$0xff]   ;;  %v4316_v23 = vld [vmem:[%s5035_s17 + $0x1e8] ss:$16 sps:$4 sm:$0xff]  }
 0x290   : > { %2605 = vmatpush1.bf16.msra.mxu0 %v4255_v63  ;;  %2687 = vmatpush1.bf16.msra.mxu1 %v4256_v2  ;;  %v4320_v45 = vld [vmem:[%s5035_s17 + $0x204] ss:$16 sps:$4 sm:$0xff]   ;;  %v4323_v46 = vld [vmem:[%s5035_s17 + $0x20c] ss:$16 sps:$4 sm:$0xff]   ;;  %v4318_v47 = vld [vmem:[%s5035_s17 + $0x200] ss:$16 sps:$4 sm:$0xff]  }
 0x291   : > { %2606 = vmatprep.subr.bf16.mxu0 %v4257_v3  ;;  %2688 = vmatprep.subr.bf16.mxu1 %v4259_v4  ;;  %v4321_v49 = vld [vmem:[%s5035_s17 + $0x208] ss:$16 sps:$4 sm:$0xff]   ;;  %v4327_v50 = vld [vmem:[%s5035_s17 + $0x224] ss:$16 sps:$4 sm:$0xff]   ;;  %v4330_v51 = vld [vmem:[%s5035_s17 + $0x22c] ss:$16 sps:$4 sm:$0xff]  }
 0x292   : > { %v4325_v52 = vld [vmem:[%s5035_s17 + $0x220] ss:$16 sps:$4 sm:$0xff]   ;;  %v4328_v53 = vld [vmem:[%s5035_s17 + $0x228] ss:$16 sps:$4 sm:$0xff]   ;;  %v4333_v54 = vld [vmem:[%s5035_s17 + $0x244] ss:$16 sps:$4 sm:$0xff]  }
 0x293   : > { %v4336_v55 = vld [vmem:[%s5035_s17 + $0x24c] ss:$16 sps:$4 sm:$0xff]   ;;  %v4331_v56 = vld [vmem:[%s5035_s17 + $0x240] ss:$16 sps:$4 sm:$0xff]   ;;  %v4334_v57 = vld [vmem:[%s5035_s17 + $0x248] ss:$16 sps:$4 sm:$0xff]  }
 0x294   : > { %2607 = vmatpush1.bf16.msra.mxu0 %v4261_v5  ;;  %2689 = vmatpush1.bf16.msra.mxu1 %v4262_v6  ;;  %v4339_v58 = vld [vmem:[%s5035_s17 + $0x264] ss:$16 sps:$4 sm:$0xff]   ;;  %v4342_v59 = vld [vmem:[%s5035_s17 + $0x26c] ss:$16 sps:$4 sm:$0xff]   ;;  %v4337_v60 = vld [vmem:[%s5035_s17 + $0x260] ss:$16 sps:$4 sm:$0xff]  }
 0x295   : > { %2608 = vmatprep.subr.bf16.mxu0 %v4263_v7  ;;  %2690 = vmatprep.subr.bf16.mxu1 %v4265_v8  ;;  %v4340_v61 = vld [vmem:[%s5035_s17 + $0x268] ss:$16 sps:$4 sm:$0xff]   ;;  %v4345_v62 = vld [vmem:[%s5035_s17 + $0x284] ss:$16 sps:$4 sm:$0xff]   ;;  %v4348_v63 = vld [vmem:[%s5035_s17 + $0x28c] ss:$16 sps:$4 sm:$0xff]  }
 0x296   : > { %v4343_v2 = vld [vmem:[%s5035_s17 + $0x280] ss:$16 sps:$4 sm:$0xff]   ;;  %v4346_v3 = vld [vmem:[%s5035_s17 + $0x288] ss:$16 sps:$4 sm:$0xff]   ;;  %v4351_v4 = vld [vmem:[%s5035_s17 + $0x2a4] ss:$16 sps:$4 sm:$0xff]  }
 0x297   : > { %v4354_v5 = vld [vmem:[%s5035_s17 + $0x2ac] ss:$16 sps:$4 sm:$0xff]   ;;  %v4349_v6 = vld [vmem:[%s5035_s17 + $0x2a0] ss:$16 sps:$4 sm:$0xff]   ;;  %v4352_v7 = vld [vmem:[%s5035_s17 + $0x2a8] ss:$16 sps:$4 sm:$0xff]  }
 0x298   : > { %2609 = vmatpush1.bf16.msra.mxu0 %v4267_v9  ;;  %2691 = vmatpush1.bf16.msra.mxu1 %v4268_v10  ;;  %v4357_v8 = vld [vmem:[%s5035_s17 + $0x2c4] ss:$16 sps:$4 sm:$0xff]   ;;  %v4360_v9 = vld [vmem:[%s5035_s17 + $0x2cc] ss:$16 sps:$4 sm:$0xff]   ;;  %v4376_v29 = vld [vmem:[%s5035_s17 + $0x328] ss:$16 sps:$4 sm:$0xff]  }
 0x299   : > { %2610 = vmatprep.subr.bf16.mxu0 %v4269_v11  ;;  %2692 = vmatprep.subr.bf16.mxu1 %v4271_v12  ;;  %v5191_v10 = vld [vmem:[#allocation2 + $0x8] sm:$0xff]  ;;  %v4355_v12 = vld [vmem:[%s5035_s17 + $0x2c0] ss:$16 sps:$4 sm:$0xff]  }
 0x29a   : > { %v3614_v11 = vcombine.high %v5191_v10, %v5191_v10  ;;  %v4384_v31 = vld [vmem:[%s5035_s17 + $0x34c] ss:$16 sps:$4 sm:$0xff]  }
 0x29c   : > { %2611 = vmatpush1.bf16.msra.mxu0 %v4273_v13  ;;  %2693 = vmatpush1.bf16.msra.mxu1 %v4274_v14  ;;  %v4358_v13 = vld [vmem:[%s5035_s17 + $0x2c8] ss:$16 sps:$4 sm:$0xff]   ;;  %v4363_v14 = vld [vmem:[%s5035_s17 + $0x2e4] ss:$16 sps:$4 sm:$0xff]  }
 0x29d   : > { %2612 = vmatprep.subr.bf16.mxu0 %v4275_v15  ;;  %2694 = vmatprep.subr.bf16.mxu1 %v4277_v16  ;;  %v4366_v15 = vld [vmem:[%s5035_s17 + $0x2ec] ss:$16 sps:$4 sm:$0xff]   ;;  %v4361_v16 = vld [vmem:[%s5035_s17 + $0x2e0] ss:$16 sps:$4 sm:$0xff]  }
 0x2a0   : > { %2613 = vmatpush1.bf16.msra.mxu0 %v4279_v17  ;;  %2695 = vmatpush1.bf16.msra.mxu1 %v4280_v18  ;;  %v4364_v17 = vld [vmem:[%s5035_s17 + $0x2e8] ss:$16 sps:$4 sm:$0xff]   ;;  %v4369_v18 = vld [vmem:[%s5035_s17 + $0x304] ss:$16 sps:$4 sm:$0xff]  }
 0x2a1   : > { %2614 = vmatprep.subr.bf16.mxu0 %v4281_v19  ;;  %2696 = vmatprep.subr.bf16.mxu1 %v4283_v24  ;;  %v4372_v19 = vld [vmem:[%s5035_s17 + $0x30c] ss:$16 sps:$4 sm:$0xff]   ;;  %v4367_v24 = vld [vmem:[%s5035_s17 + $0x300] ss:$16 sps:$4 sm:$0xff]  }
 0x2a4   : > { %2615 = vmatpush1.bf16.msra.mxu0 %v4285_v25  ;;  %2697 = vmatpush1.bf16.msra.mxu1 %v4286_v26  ;;  %v4370_v25 = vld [vmem:[%s5035_s17 + $0x308] ss:$16 sps:$4 sm:$0xff]   ;;  %v4375_v26 = vld [vmem:[%s5035_s17 + $0x324] ss:$16 sps:$4 sm:$0xff]  }
 0x2a5   : > { %2616 = vmatprep.subr.bf16.mxu0 %v4287_v27  ;;  %2698 = vmatprep.subr.bf16.mxu1 %v4289_v28  ;;  %v4378_v27 = vld [vmem:[%s5035_s17 + $0x32c] ss:$16 sps:$4 sm:$0xff]   ;;  %v4373_v28 = vld [vmem:[%s5035_s17 + $0x320] ss:$16 sps:$4 sm:$0xff]  }
 0x2a8   : > { %2617 = vmatpush1.bf16.msra.mxu0 %v4291_v30  ;;  %2699 = vmatpush1.bf16.msra.mxu1 %v4292_v32  ;;  %v4381_v30 = vld [vmem:[%s5035_s17 + $0x344] ss:$16 sps:$4 sm:$0xff]   ;;  %v4379_v32 = vld [vmem:[%s5035_s17 + $0x340] ss:$16 sps:$4 sm:$0xff]  }
 0x2a9   : > { %2618 = vmatprep.subr.bf16.mxu0 %v4293_v33  ;;  %2700 = vmatprep.subr.bf16.mxu1 %v4295_v34  ;;  %v4382_v33 = vld [vmem:[%s5035_s17 + $0x348] ss:$16 sps:$4 sm:$0xff]   ;;  %v4387_v34 = vld [vmem:[%s5035_s17 + $0x364] ss:$16 sps:$4 sm:$0xff]  }
 0x2ac   : > { %2619 = vmatpush1.bf16.msra.mxu0 %v4297_v35  ;;  %2701 = vmatpush1.bf16.msra.mxu1 %v4298_v36  ;;  %v4390_v35 = vld [vmem:[%s5035_s17 + $0x36c] ss:$16 sps:$4 sm:$0xff]   ;;  %v4385_v36 = vld [vmem:[%s5035_s17 + $0x360] ss:$16 sps:$4 sm:$0xff]  }
 0x2ad   : > { %2620 = vmatprep.subr.bf16.mxu0 %v4299_v37  ;;  %2702 = vmatprep.subr.bf16.mxu1 %v4301_v38  ;;  %v4388_v37 = vld [vmem:[%s5035_s17 + $0x368] ss:$16 sps:$4 sm:$0xff]   ;;  %v4393_v38 = vld [vmem:[%s5035_s17 + $0x384] ss:$16 sps:$4 sm:$0xff]  }
 0x2b0   : > { %2621 = vmatpush1.bf16.msra.mxu0 %v4303_v39  ;;  %2703 = vmatpush1.bf16.msra.mxu1 %v4304_v40  ;;  %v4396_v39 = vld [vmem:[%s5035_s17 + $0x38c] ss:$16 sps:$4 sm:$0xff]   ;;  %v4391_v40 = vld [vmem:[%s5035_s17 + $0x380] ss:$16 sps:$4 sm:$0xff]  }
 0x2b1   : > { %2622 = vmatprep.subr.bf16.mxu0 %v4305_v41  ;;  %2704 = vmatprep.subr.bf16.mxu1 %v4307_v42  ;;  %v4394_v41 = vld [vmem:[%s5035_s17 + $0x388] ss:$16 sps:$4 sm:$0xff]   ;;  %v4399_v42 = vld [vmem:[%s5035_s17 + $0x3a4] ss:$16 sps:$4 sm:$0xff]  }
 0x2b4   : > { %2623 = vmatpush1.bf16.msra.mxu0 %v4309_v43  ;;  %2705 = vmatpush1.bf16.msra.mxu1 %v4310_v44  ;;  %v4402_v43 = vld [vmem:[%s5035_s17 + $0x3ac] ss:$16 sps:$4 sm:$0xff]   ;;  %v4397_v44 = vld [vmem:[%s5035_s17 + $0x3a0] ss:$16 sps:$4 sm:$0xff]  }
 0x2b5   : > { %2624 = vmatprep.subr.bf16.mxu0 %v4311_v20  ;;  %2706 = vmatprep.subr.bf16.mxu1 %v4313_v21  ;;  %v4400_v20 = vld [vmem:[%s5035_s17 + $0x3a8] ss:$16 sps:$4 sm:$0xff]   ;;  %v4405_v21 = vld [vmem:[%s5035_s17 + $0x3c4] ss:$16 sps:$4 sm:$0xff]  }
 0x2b8   : > { %2625 = vmatpush1.bf16.msra.mxu0 %v4315_v22  ;;  %2707 = vmatpush1.bf16.msra.mxu1 %v4316_v23  ;;  %v4408_v22 = vld [vmem:[%s5035_s17 + $0x3cc] ss:$16 sps:$4 sm:$0xff]   ;;  %v4403_v23 = vld [vmem:[%s5035_s17 + $0x3c0] ss:$16 sps:$4 sm:$0xff]  }
 0x2b9   : > { %2635 = vmatprep.subr.bf16.mxu0 %v4320_v45  ;;  %2717 = vmatprep.subr.bf16.mxu1 %v4323_v46  ;;  %v4406_v45 = vld [vmem:[%s5035_s17 + $0x3c8] ss:$16 sps:$4 sm:$0xff]   ;;  %v4411_v46 = vld [vmem:[%s5035_s17 + $0x3e4] ss:$16 sps:$4 sm:$0xff]  }
 0x2bb   : > { %2627 = vmatmul.mubr.bf16.vlgmr.msra.gmra.mrb[0].mxu0 %v3611_v48  ;;  %2709 = vmatmul.mubr.bf16.vlgmr.msra.gmra.mrb[0].mxu1 %v3611_v48  ;;  %v4409_v48 = vld [vmem:[%s5035_s17 + $0x3e0] ss:$16 sps:$4 sm:$0xff]  }
 0x2bc   : > { %2636 = vmatpush1.bf16.msra.mxu0 %v4318_v47  ;;  %2718 = vmatpush1.bf16.msra.mxu1 %v4321_v49  ;;  %v4414_v47 = vld [vmem:[%s5035_s17 + $0x3ec] ss:$16 sps:$4 sm:$0xff]   ;;  %v4412_v49 = vld [vmem:[%s5035_s17 + $0x3e8] ss:$16 sps:$4 sm:$0xff]  }
 0x2bd   : > { %2637 = vmatprep.subr.bf16.mxu0 %v4327_v50  ;;  %2719 = vmatprep.subr.bf16.mxu1 %v4330_v51  ;;  %v3613_v50 = vcombine.low %v5191_v10, %v5191_v10 }
 0x2be   : > { %2667 = vmatprep.mubr.bf16.mxu0 %v3614_v11  ;;  %2749 = vmatprep.mubr.bf16.mxu1 %v3614_v11 }
 0x2c0   : > { %2638 = vmatpush1.bf16.msra.mxu0 %v4325_v52  ;;  %2720 = vmatpush1.bf16.msra.mxu1 %v4328_v53 }
 0x2c1   : > { %2639 = vmatprep.subr.bf16.mxu0 %v4333_v54  ;;  %2721 = vmatprep.subr.bf16.mxu1 %v4336_v55 }
 0x2c4   : > { %2640 = vmatpush1.bf16.msra.mxu0 %v4331_v56  ;;  %2722 = vmatpush1.bf16.msra.mxu1 %v4334_v57 }
 0x2c5   : > { %2641 = vmatprep.subr.bf16.mxu0 %v4339_v58  ;;  %2723 = vmatprep.subr.bf16.mxu1 %v4342_v59 }
 0x2c8   : > { %2642 = vmatpush1.bf16.msra.mxu0 %v4337_v60  ;;  %2724 = vmatpush1.bf16.msra.mxu1 %v4340_v61 }
 0x2c9   : > { %2643 = vmatprep.subr.bf16.mxu0 %v4345_v62  ;;  %2725 = vmatprep.subr.bf16.mxu1 %v4348_v63 }
 0x2cc   : > { %2644 = vmatpush1.bf16.msra.mxu0 %v4343_v2  ;;  %2726 = vmatpush1.bf16.msra.mxu1 %v4346_v3 }
 0x2cd   : > { %2645 = vmatprep.subr.bf16.mxu0 %v4351_v4  ;;  %2727 = vmatprep.subr.bf16.mxu1 %v4354_v5 }
 0x2d0   : > { %2646 = vmatpush1.bf16.msra.mxu0 %v4349_v6  ;;  %2728 = vmatpush1.bf16.msra.mxu1 %v4352_v7 }
 0x2d1   : > { %2647 = vmatprep.subr.bf16.mxu0 %v4357_v8  ;;  %2729 = vmatprep.subr.bf16.mxu1 %v4360_v9 }
 0x2d4   : > { %2648 = vmatpush1.bf16.msra.mxu0 %v4355_v12  ;;  %2730 = vmatpush1.bf16.msra.mxu1 %v4358_v13 }
 0x2d5   : > { %2649 = vmatprep.subr.bf16.mxu0 %v4363_v14  ;;  %2731 = vmatprep.subr.bf16.mxu1 %v4366_v15 }
 0x2d8   : > { %2650 = vmatpush1.bf16.msra.mxu0 %v4361_v16  ;;  %2732 = vmatpush1.bf16.msra.mxu1 %v4364_v17 }
 0x2d9   : > { %2651 = vmatprep.subr.bf16.mxu0 %v4369_v18  ;;  %2733 = vmatprep.subr.bf16.mxu1 %v4372_v19 }
 0x2dc   : > { %2652 = vmatpush1.bf16.msra.mxu0 %v4367_v24  ;;  %2734 = vmatpush1.bf16.msra.mxu1 %v4370_v25 }
 0x2dd   : > { %2653 = vmatprep.subr.bf16.mxu0 %v4375_v26  ;;  %2735 = vmatprep.subr.bf16.mxu1 %v4378_v27 }
 0x2e0   : > { %2654 = vmatpush1.bf16.msra.mxu0 %v4373_v28  ;;  %2736 = vmatpush1.bf16.msra.mxu1 %v4376_v29 }
 0x2e1   : > { %2655 = vmatprep.subr.bf16.mxu0 %v4381_v30  ;;  %2737 = vmatprep.subr.bf16.mxu1 %v4384_v31 }
 0x2e4   : > { %2656 = vmatpush1.bf16.msra.mxu0 %v4379_v32  ;;  %2738 = vmatpush1.bf16.msra.mxu1 %v4382_v33 }
 0x2e5   : > { %2657 = vmatprep.subr.bf16.mxu0 %v4387_v34  ;;  %2739 = vmatprep.subr.bf16.mxu1 %v4390_v35 }
 0x2e8   : > { %2658 = vmatpush1.bf16.msra.mxu0 %v4385_v36  ;;  %2740 = vmatpush1.bf16.msra.mxu1 %v4388_v37 }
 0x2e9   : > { %2659 = vmatprep.subr.bf16.mxu0 %v4393_v38  ;;  %2741 = vmatprep.subr.bf16.mxu1 %v4396_v39 }
 0x2ec   : > { %2660 = vmatpush1.bf16.msra.mxu0 %v4391_v40  ;;  %2742 = vmatpush1.bf16.msra.mxu1 %v4394_v41 }
 0x2ed   : > { %2661 = vmatprep.subr.bf16.mxu0 %v4399_v42  ;;  %2743 = vmatprep.subr.bf16.mxu1 %v4402_v43 }
 0x2f0   : > { %2662 = vmatpush1.bf16.msra.mxu0 %v4397_v44  ;;  %2744 = vmatpush1.bf16.msra.mxu1 %v4400_v20 }
 0x2f1   : > { %2663 = vmatprep.subr.bf16.mxu0 %v4405_v21  ;;  %2745 = vmatprep.subr.bf16.mxu1 %v4408_v22 }
 0x2f4   : > { %2664 = vmatpush1.bf16.msra.mxu0 %v4403_v23  ;;  %2746 = vmatpush1.bf16.msra.mxu1 %v4406_v45 }
 0x2f5   : > { %2665 = vmatprep.subr.bf16.mxu0 %v4411_v46  ;;  %2747 = vmatprep.subr.bf16.mxu1 %v4414_v47 }
 0x2f8   : > { %2666 = vmatpush1.bf16.msra.mxu0 %v4409_v48  ;;  %2748 = vmatpush1.bf16.msra.mxu1 %v4412_v49 }
 0x2fb   : > { %2668 = vmatmul.mubr.bf16.vlgmr.msra.gmra.mrb[0].mxu0 %v3613_v50  ;;  %2750 = vmatmul.mubr.bf16.vlgmr.msra.gmra.mrb[0].mxu1 %v3613_v50 }
 0x3ce   : > { %v2669_v51 = vpop.f32.mrb[0].mxu0  ;;  %v2751_v52 = vpop.f32.mrb[0].mxu1 }
 0x3cf   : > { %v2758_v53 = vrot.slane %v2669_v51, 4  ;;  %v2770_v54 = vrot.slane %v2751_v52, 4  ;;  %v2671_v55 = vpop.f32.mrb[1].mxu0  ;;  %v2753_v56 = vpop.f32.mrb[1].mxu1 }
 0x3d0   : > { %v2764_v57 = vrot.slane %v2671_v55, 4  ;;  %v2776_v58 = vrot.slane %v2753_v56, 4  ;;  %v2673_v59 = vpop.f32.mrb[2].mxu0  ;;  %v2755_v60 = vpop.f32.mrb[2].mxu1 }
 0x3d1   : > { %v2759_v61 = vadd.f32 %v2758_v53, %v2669_v51  ;;  %v2771_v62 = vadd.f32 %v2770_v54, %v2751_v52  ;;  %v2674_v63 = vpop.f32.mrb[3].mxu0  ;;  %v2756_v2 = vpop.f32.mrb[3].mxu1 }
 0x3d2   : > { %v2765_v3 = vadd.f32 %v2764_v57, %v2671_v55  ;;  %v2777_v4 = vadd.f32 %v2776_v58, %v2753_v56 }
 0x3d3   : > { %v2760_v5 = vrot.slane %v2759_v61, 2  ;;  %v2772_v6 = vrot.slane %v2771_v62, 2 }
 0x3d4   : > { %v2766_v7 = vrot.slane %v2765_v3, 2  ;;  %v2778_v8 = vrot.slane %v2777_v4, 2 }
 0x3d5   : > { %v2761_v9 = vadd.f32 %v2760_v5, %v2759_v61  ;;  %v2773_v10 = vadd.f32 %v2772_v6, %v2771_v62  ;;  %v2840_v5 = vlaneseq }
 0x3d6   : > { %v2767_v11 = vadd.f32 %v2766_v7, %v2765_v3  ;;  %v2779_v12 = vadd.f32 %v2778_v8, %v2777_v4  ;;  %v4722_v3 = vmov 1966171168  }
 0x3d7   : > { %v2762_v13 = vrot.slane %v2761_v9, 1  ;;  %v2774_v14 = vrot.slane %v2773_v10, 1  ;;  %v2838_v4 = vunpack.c.l.s4 %v4722_v3  ;;  %v2841_v7 = vshrl.u32 %v2840_v5, 7 }
 0x3d8   : > { %v2768_v15 = vrot.slane %v2767_v11, 1  ;;  %v2780_v16 = vrot.slane %v2779_v12, 1 }
 0x3d9   : > { %v2763_v17 = vadd.f32 %v2762_v13, %v2761_v9  ;;  %v2775_v18 = vadd.f32 %v2774_v14, %v2773_v10  ;;  %v2839_v6 = vunpack.c.0.s8 %v2838_v4 }
 0x3da   : > { %v2769_v19 = vadd.f32 %v2768_v15, %v2767_v11  ;;  %v2781_v24 = vadd.f32 %v2780_v16, %v2779_v12 }
 0x3db   : > { %v2783_v25 = vmul.f32 0.125, %v2763_v17  ;;  %v2785_v26 = vmul.f32 0.125, %v2775_v18  ;;  %v2842_v10 = vsub.s32 %v2839_v6, %v2841_v7  ;;  %v2864_v18 = vsub.s32 0, %v2841_v7 }
 0x3dc   : > { %v2784_v27 = vmul.f32 0.125, %v2769_v19  ;;  %v2786_v28 = vmul.f32 0.125, %v2781_v24  ;;  %v2868_v24 = vsub.s32 1, %v2841_v7 }
 0x3dd   : > { %v5235_v29 = vsub.f32 %v2669_v51, %v2783_v25  ;;  %v5237_v30 = vsub.f32 %v2751_v52, %v2785_v26  ;;  %v2872_v25 = vsub.s32 2, %v2841_v7  ;;  %v2876_v26 = vsub.s32 3, %v2841_v7 }
 0x3de   : > { %v5239_v31 = vsub.f32 %v2671_v55, %v2784_v27  ;;  %v5241_v32 = vsub.f32 %v2753_v56, %v2786_v28  ;;  %v2890_v28 = vrot.slane %v5056_v1, %v2864_v18 }
 0x3df   : > { %v2791_v33 = vmul.f32 %v5235_v29, %v5235_v29  ;;  %v2793_v34 = vmul.f32 %v5237_v30, %v5237_v30 }
 0x3e0   : > { %v2792_v35 = vmul.f32 %v5239_v31, %v5239_v31  ;;  %v2794_v36 = vmul.f32 %v5241_v32, %v5241_v32 }
 0x3e1   : > { %v2795_v37 = vrot.slane %v2791_v33, 4  ;;  %v2807_v38 = vrot.slane %v2793_v34, 4 }
 0x3e2   : > { %v2801_v39 = vrot.slane %v2792_v35, 4  ;;  %v2813_v40 = vrot.slane %v2794_v36, 4 }
 0x3e3   : > { %v2796_v41 = vadd.f32 %v2795_v37, %v2791_v33  ;;  %v2808_v42 = vadd.f32 %v2807_v38, %v2793_v34  ;;  %v2894_v33 = vrot.slane %v5056_v1, %v2868_v24  ;;  %v2898_v34 = vrot.slane %v5056_v1, %v2872_v25 }
 0x3e4   : > { %v2802_v43 = vadd.f32 %v2801_v39, %v2792_v35  ;;  %v2814_v44 = vadd.f32 %v2813_v40, %v2794_v36  ;;  %v2902_v35 = vrot.slane %v5056_v1, %v2876_v26 }
 0x3e5   : > { %v2797_v20 = vrot.slane %v2796_v41, 2  ;;  %v2809_v21 = vrot.slane %v2808_v42, 2 }
 0x3e6   : > { %v2803_v22 = vrot.slane %v2802_v43, 2  ;;  %v2815_v23 = vrot.slane %v2814_v44, 2 }
 0x3e7   : > { %v2798_v45 = vadd.f32 %v2797_v20, %v2796_v41  ;;  %v2810_v46 = vadd.f32 %v2809_v21, %v2808_v42 }
 0x3e8   : > { %v2804_v47 = vadd.f32 %v2803_v22, %v2802_v43  ;;  %v2816_v48 = vadd.f32 %v2815_v23, %v2814_v44 }
 0x3e9   : > { %v2799_v49 = vrot.slane %v2798_v45, 1  ;;  %v2811_v50 = vrot.slane %v2810_v46, 1 }
 0x3ea   : > { %v2805_v51 = vrot.slane %v2804_v47, 1  ;;  %v2817_v52 = vrot.slane %v2816_v48, 1 }
 0x3eb   : > { %v2800_v53 = vadd.f32 %v2799_v49, %v2798_v45  ;;  %v2812_v54 = vadd.f32 %v2811_v50, %v2810_v46 }
 0x3ec   : > { %v2806_v55 = vadd.f32 %v2805_v51, %v2804_v47  ;;  %v2818_v56 = vadd.f32 %v2817_v52, %v2816_v48 }
 0x3ed   : > { %v2819_v57 = vmul.f32 0.125, %v2800_v53  ;;  %v2821_v58 = vmul.f32 0.125, %v2812_v54 }
 0x3ee   : > { %v2820_v59 = vmul.f32 0.125, %v2806_v55  ;;  %v2822_v60 = vmul.f32 0.125, %v2818_v56 }
 0x3ef   : > { %v2823_v61 = vadd.f32 1e-05, %v2819_v57  ;;  %v2825_v62 = vadd.f32 1e-05, %v2821_v58 }
 0x3f0   : > { %v2824_v63 = vadd.f32 1e-05, %v2820_v59  ;;  %v2826_v2 = vadd.f32 1e-05, %v2822_v60 }
 0x3f1   : > { %4417 = vrsqrt.f32 %v2823_v61 }
 0x3f2   : > { %4419 = vrsqrt.f32 %v2825_v62 }
 0x3f3   : > { %4421 = vrsqrt.f32 %v2824_v63 }
 0x3f4   : > { %4423 = vrsqrt.f32 %v2826_v2 }
 0x3fb   : > { %v4418_v8 = vpop.eup %4417 }
 0x3fc   : > { %v4420_v9 = vpop.eup %4419 }
 0x3fd   : > { %v4422_v11 = vpop.eup %4421 }
 0x3fe   : > { %v4424_v12 = vpop.eup %4423  ;;  %v2835_v13 = vcombine.low %v4418_v8, %v4422_v11 }
 0x3ff   : > { %v2836_v14 = vcombine.low %v4420_v9, %v4424_v12 }
 0x400   : > { %v2843_v15 = vrot.slane %v2835_v13, %v2842_v10 }
 0x401   : > { %v2850_v16 = vrot.slane %v2836_v14, %v2842_v10 }
 0x403   : > { %v2851_v17 = vcombine.low %v2843_v15, %v2850_v16 }
 0x405   : > { %v2858_v19 = vrot.slane %v2851_v17, %v2842_v10 }
 0x407   : > { %v2860_v27 = vmul.f32 %v2858_v19, %v5054_v0 }
 0x409   : > { %v2865_v36 = vrot.slane %v2860_v27, %v2864_v18  ;;  %v2869_v37 = vrot.slane %v2860_v27, %v2868_v24  ;;  %v2873_v38 = vrot.slane %v2860_v27, %v2872_v25  ;;  %v2877_v39 = vrot.slane %v2860_v27, %v2876_v26 }
 0x40b   : > { %v2882_v40 = vmul.f32 %v2865_v36, %v5235_v29  ;;  %v2883_v41 = vmul.f32 %v2869_v37, %v5239_v31  ;;  %v2884_v42 = vmul.f32 %v2873_v38, %v5237_v30  ;;  %v2885_v0 = vmul.f32 %v2877_v39, %v5241_v32 }
 0x40d   : > { %v2907_v43 = vadd.f32 %v2890_v28, %v2882_v40  ;;  %v2908_v44 = vadd.f32 %v2894_v33, %v2883_v41  ;;  %v2909_v20 = vadd.f32 %v2898_v34, %v2884_v42  ;;  %v2910_v21 = vadd.f32 %v2902_v35, %v2885_v0 }
 0x40f   : > { %v2911_v22 = vmax.f32 %v2907_v43, 0.0  ;;  %v2912_v23 = vmax.f32 %v2908_v44, 0.0  ;;  %v2913_v45 = vmax.f32 %v2909_v20, 0.0  ;;  %v2914_v1 = vmax.f32 %v2910_v21, 0.0 }
 0x411   : > { %v3792_v46 = vpack.c.bf16 %v2912_v23, %v2911_v22  ;;  %v3793_v47 = vpack.c.bf16 %v2914_v1, %v2913_v45 }
 0x413   : > { %2931 = vst [vmem:[#allocation2] sm:$0xff] %v3792_v46  ;;  %2932 = vst [vmem:[#allocation2 + $0x8] sm:$0xff] %v3793_v47 }
 0x414 PF: > { %p3745_p6 = scmp.ne.s32.totalorder %s4796_s8, 5 }
 0x415   : > { %s5449_s21 = sld [smem:[#allocation20_spill]] (!%p3745_p6)  ;;  %v3746_v26 = vld [vmem:[#allocation11] ss:$0 sm:$0xff] (!%p3745_p6)  ;;  %vm3296_vm0 = vcmask (!%p3745_p6), 80896  }
 0x416   : > { %2936 = sbr.rel (%p3745_p6) target bundleno = 1305 (0x519), region = 80 }
 0x41a   : > { %v2937_v14 = vld [vmem:[#allocation2] sm:$0xff] (!%p3745_p6)  ;;  %v2938_v15 = vld [vmem:[#allocation2 + $0x8] sm:$0xff] (!%p3745_p6) }
 0x41b   : > { %v4425_v29 = vld [vmem:[%s5449_s21 + $0x40] sm:$0xff] (!%p3745_p6)   ;;  %v4429_v48 = vld [vmem:[%s5449_s21 + $0x48] sm:$0xff] (!%p3745_p6)   ;;  %v4433_v52 = vld [vmem:[%s5449_s21 + $0x50] sm:$0xff] (!%p3745_p6)   ;;  %v3747_v16 = vcombine.low (!%p3745_p6), %v2937_v14, %v2937_v14  ;;  %v3748_v17 = vcombine.high (!%p3745_p6), %v2937_v14, %v2937_v14  ;;  %v3749_v18 = vcombine.low (!%p3745_p6), %v2938_v15, %v2938_v15  ;;  %v3750_v19 = vcombine.high (!%p3745_p6), %v2938_v15, %v2938_v15 }
 0x41c   : > { %v4426_v30 = vld [vmem:[%s5449_s21 + $0xc0] sm:$0xff] (!%p3745_p6)   ;;  %3794 = vmatprep.subr.bf16.mxu0 (!%p3745_p6), %v4425_v29  ;;  %v4430_v49 = vld [vmem:[%s5449_s21 + $0xc8] sm:$0xff] (!%p3745_p6)   ;;  %v4434_v53 = vld [vmem:[%s5449_s21 + $0xd0] sm:$0xff] (!%p3745_p6)  }
 0x41d   : > { %v4427_v31 = vld [vmem:[%s5449_s21] sm:$0xff]   ;;  %3816 = vmatprep.subr.bf16.mxu1 %v4426_v30  ;;  %v4431_v50 = vld [vmem:[%s5449_s21 + $0x8] sm:$0xff]   ;;  %v4435_v54 = vld [vmem:[%s5449_s21 + $0x10] sm:$0xff]   ;;  %3248 = vmatprep.mubr.bf16.mxu0 %v3748_v17 }
 0x41e   : > { %v4428_v32 = vld [vmem:[%s5449_s21 + $0x80] sm:$0xff]   ;;  %3795 = vmatpush3.bf16.msra.mxu0 %v4427_v31  ;;  %v4432_v51 = vld [vmem:[%s5449_s21 + $0x88] sm:$0xff]   ;;  %v4436_v55 = vld [vmem:[%s5449_s21 + $0x90] sm:$0xff]   ;;  %3288 = vmatprep.mubr.bf16.mxu1 %v3750_v19 }
 0x41f   : > { %3817 = vmatpush3.bf16.msra.mxu1 %v4428_v32  ;;  %3796 = vmatprep.subr.bf16.mxu0 %v4429_v48  ;;  %v4437_v56 = vld [vmem:[%s5449_s21 + $0x58] sm:$0xff]   ;;  %v4441_v60 = vld [vmem:[%s5449_s21 + $0x60] sm:$0xff]   ;;  %v4445_v2 = vld [vmem:[%s5449_s21 + $0x68] sm:$0xff]  }
 0x420   : > { %3818 = vmatprep.subr.bf16.mxu1 %v4430_v49  ;;  %v4438_v57 = vld [vmem:[%s5449_s21 + $0xd8] sm:$0xff]   ;;  %v4442_v61 = vld [vmem:[%s5449_s21 + $0xe0] sm:$0xff]   ;;  %v4446_v3 = vld [vmem:[%s5449_s21 + $0xe8] sm:$0xff]  }
 0x421   : > { %v4439_v58 = vld [vmem:[%s5449_s21 + $0x18] sm:$0xff]   ;;  %v4443_v62 = vld [vmem:[%s5449_s21 + $0x20] sm:$0xff]   ;;  %v4447_v4 = vld [vmem:[%s5449_s21 + $0x28] sm:$0xff]  }
 0x422   : > { %3797 = vmatpush3.bf16.msra.mxu0 %v4431_v50  ;;  %v4440_v59 = vld [vmem:[%s5449_s21 + $0x98] sm:$0xff]   ;;  %v4444_v63 = vld [vmem:[%s5449_s21 + $0xa0] sm:$0xff]   ;;  %v4448_v5 = vld [vmem:[%s5449_s21 + $0xa8] sm:$0xff]  }
 0x423   : > { %3819 = vmatpush3.bf16.msra.mxu1 %v4432_v51  ;;  %3798 = vmatprep.subr.bf16.mxu0 %v4433_v52  ;;  %v4449_v6 = vld [vmem:[%s5449_s21 + $0x70] sm:$0xff]   ;;  %v4453_v10 = vld [vmem:[%s5449_s21 + $0x78] sm:$0xff]  }
 0x424   : > { %3820 = vmatprep.subr.bf16.mxu1 %v4434_v53  ;;  %v4450_v7 = vld [vmem:[%s5449_s21 + $0xf0] sm:$0xff]   ;;  %v4454_v11 = vld [vmem:[%s5449_s21 + $0xf8] sm:$0xff]  }
 0x425   : > { %v4451_v8 = vld [vmem:[%s5449_s21 + $0x30] sm:$0xff]   ;;  %v4455_v12 = vld [vmem:[%s5449_s21 + $0x38] sm:$0xff]  }
 0x426   : > { %3799 = vmatpush3.bf16.msra.mxu0 %v4435_v54  ;;  %v4452_v9 = vld [vmem:[%s5449_s21 + $0xb0] sm:$0xff]   ;;  %v4456_v13 = vld [vmem:[%s5449_s21 + $0xb8] sm:$0xff]  }
 0x427   : > { %3821 = vmatpush3.bf16.msra.mxu1 %v4436_v55  ;;  %3800 = vmatprep.subr.bf16.mxu0 %v4437_v56 }
 0x428   : > { %3822 = vmatprep.subr.bf16.mxu1 %v4438_v57 }
 0x42a   : > { %3801 = vmatpush3.bf16.msra.mxu0 %v4439_v58 }
 0x42b   : > { %3823 = vmatpush3.bf16.msra.mxu1 %v4440_v59  ;;  %3802 = vmatprep.subr.bf16.mxu0 %v4441_v60 }
 0x42c   : > { %3824 = vmatprep.subr.bf16.mxu1 %v4442_v61 }
 0x42e   : > { %3803 = vmatpush3.bf16.msra.mxu0 %v4443_v62 }
 0x42f   : > { %3825 = vmatpush3.bf16.msra.mxu1 %v4444_v63  ;;  %3804 = vmatprep.subr.bf16.mxu0 %v4445_v2 }
 0x430   : > { %3826 = vmatprep.subr.bf16.mxu1 %v4446_v3 }
 0x432   : > { %3805 = vmatpush3.bf16.msra.mxu0 %v4447_v4 }
 0x433   : > { %3827 = vmatpush3.bf16.msra.mxu1 %v4448_v5  ;;  %3806 = vmatprep.subr.bf16.mxu0 %v4449_v6 }
 0x434   : > { %3828 = vmatprep.subr.bf16.mxu1 %v4450_v7 }
 0x436   : > { %3807 = vmatpush3.bf16.msra.mxu0 %v4451_v8 }
 0x437   : > { %3829 = vmatpush3.bf16.msra.mxu1 %v4452_v9  ;;  %3808 = vmatprep.subr.bf16.mxu0 %v4453_v10 }
 0x438   : > { %3830 = vmatprep.subr.bf16.mxu1 %v4454_v11 }
 0x43a   : > { %3809 = vmatpush3.bf16.msra.mxu0 %v4455_v12 }
 0x43b   : > { %3831 = vmatpush3.bf16.msra.mxu1 %v4456_v13 }
 0x43d   : > { %3249 = vmatmul.mubr.bf16.vlgmr.msra.gmra.mrb[0].mxu0 %v3747_v16 }
 0x43e   : > { %3289 = vmatmul.mubr.bf16.vlgmr.msra.gmra.mrb[0].mxu1 %v3749_v18 }
 0x510   : > { %v3810_v24 = vpop.f32.mrb[0].mxu0 }
 0x511   : > { %v3832_v25 = vpop.f32.mrb[0].mxu1  ;;  %v3811_v27 = vpop.f32.mrb[1].mxu0 }
 0x512   : > { %v3833_v28 = vpop.f32.mrb[1].mxu1  ;;  %v3812_v33 = vadd.f32 %v3811_v27, %v3810_v24  ;;  %v3813_v35 = vpop.f32.mrb[2].mxu0 }
 0x513   : > { %v3834_v34 = vadd.f32 %v3833_v28, %v3832_v25  ;;  %v3835_v36 = vpop.f32.mrb[2].mxu1  ;;  %v3814_v37 = vpop.f32.mrb[3].mxu0 }
 0x514   : > { %v3836_v38 = vpop.f32.mrb[3].mxu1  ;;  %v3251_v39 = vadd.f32 %v3812_v33, %v3746_v26 }
 0x516   : > { %v3291_v40 = vadd.f32 %v3834_v34, %v3251_v39 }
 0x518   : > { %3297 = vst.msk [vmem:[#allocation12] sm:$0xff] %vm3296_vm0, %v3291_v40 }
 0x519 PF: > { %p3902_p9 = scmp.eq.s32.totalorder %s4796_s8, 5  ;;  %s4723_s14 = smov [#allocation12]  }
 0x51a   : > { %s3305_s18 = sshll.u32 %s4723_s14, 4  ;;  %s3306_s18 = int_to_ptr.vmem [resolvable:$true] %s3305_s18 }
 0x51b   : > { %s4607_s9 = scalar_lea.vmem %s3306_s18, 128  ;;  %p4614_p7 = scmp.lt.s32.totalorder %s3306_s18, %s3306_s18 }
 0x51c   : > { %p4608_p8 = scmp.ne.s32.totalorder %s3306_s18, %s4607_s9  ;;  %p4615_p0 = scmp.lt.s32.totalorder %s4607_s9, %s4607_s9 }
 0x51e   : > { %p4609_p11 = pnand %p4608_p8, %p3902_p9  ;;  %p4616_p12 = por %p4615_p0, %p4614_p7 }
 0x520   : > { %p4610_p13 = pneg %p4609_p11 }
 0x522   : > { %p4617_p4 = pnand %p4616_p12, %p4610_p13 }
 0x524   : > { %4620 = shalt.err (!%p4617_p4)
}
 0x525   : > { %s5450_s6 = sld [smem:[#allocation22_spill]] }
 0x52b   : > { %s4621_s5 = scalar_lea.hbm %s5450_s6, 128 }
 0x52c   : > { %p4622_p1 = scmp.ne.s32.totalorder %s5450_s6, %s4621_s5  ;;  %p4627_p3 = scmp.lt.u32.totalorder %s4621_s5, %s5450_s6 }
 0x52e   : > { %p4623_p10 = pnand %p4622_p1, %p3902_p9 }
 0x530   : > { %p4624_p2 = pneg %p4623_p10 }
 0x532   : > { %p4629_p5 = pnand %p4627_p3, %p4624_p2 }
 0x534   : > { %4632 = shalt.err (!%p4629_p5)
}
 0x535   : > { %3877 = dma.vmem_to_hbm [thread:$0]  (%p3902_p9), %s3306_s18, 128, %s5450_s6, [#allocation5]  }
 0x536   : > { %4682 = dma.done.wait (%p3902_p9), [#allocation5], 128  }
 0x537   : > { %4684 = vsyncadd (%p3902_p9), [#allocation5], 4294967168 }
 0x538 PF: > { %s5451_s7 = smov %s4954_s24  ;;  %p22_p6 = scmp.ge.s32.totalorder %s4829_s15, 8  }
 0x539   : > { %s5452_s24 = smov %s4691_s25  ;;  %s5453_s25 = smov %s4695_s26 }
 0x53a   : > { %s5454_s26 = smov %s5451_s7  ;;  %s5455_s27 = smov %s4703_s28 }
 0x53b   : > { %s5456_s28 = smov %s4707_s29  ;;  %s5457_s29 = smov %s4876_s13 }
 0x53c   : > { %s5458_s30 = smov %s4829_s15  ;;  %24 = sbr.rel (!%p22_p6) target bundleno = 14 (0xe), region = 130 }
 0x543   :  { %3318 = vsyncpa [#allocation4], 1 }
 0x544   :  { %3320 = vsyncpa [#allocation4 + $0x1], 1 }
 0x545   :  { %3321 = vsyncpa [#allocation7], 1 }
 0x546   :  { %3323 = vsyncpa [#allocation7 + $0x1], 1 }
 0x547   :  { %3324 = vsyncpa [#allocation10], 1 }
 0x548   :  { %3326 = vsyncpa [#allocation10 + $0x1], 1 }
 0x549   :  { %3327 = vsyncpa [#allocation5], 1 }
 0x54a   :  { %3329 = vsyncpa [#allocation5 + $0x1], 1 }

</bundles_post_ra>
